<compile_context>
chip_gen: v5e
topology: v5e:2x2
jax: 0.10.0
libtpu: 0.0.40
codegen_flags: <defaults>
</compile_context>

<pallas_src>
import functools

import jax
import jax.numpy as jnp
from jax import lax
from jax.experimental import pallas as pl
from jax.experimental.pallas import tpu as pltpu


def _round_up(x, m):
    return ((x + m - 1) // m) * m


def _make_kernel(tap_offsets, n_img, cpad, blk, lead):
    """Fused encoder (3x3 conv, merged-tap matmul) + ReLU + decoder (1x1 conv)."""

    def kernel(x_ref, w1_ref, b1_ref, w2_ref, b2_ref, out_ref, patch_ref):
        # x_ref    : [N, Cp, E]          bf16  per-image flat padded grid + halo
        # w1_ref   : [HID, 9*Cp]         bf16  merged per-tap encoder weights
        # b1_ref   : [HID, 1]            f32
        # w2_ref   : [NCp, HID]          bf16  decoder (1x1) weights, class-major
        # b2_ref   : [NCp, 1]            f32
        # out_ref  : [N, NCp, blk]       f32   logits on the padded grid
        # patch_ref: [9*Cp, N*blk]       bf16  VMEM im2col scratch
        img = x_ref[...]  # single VMEM load of the tiny stacked input

        # Build the merged im2col patch: exactly one shifted lane-copy per
        # (image, tap).  Destinations are tile-aligned (sublane offset t*16,
        # lane offset n*384); sources are static unaligned lane slices.
        for n in range(n_img):
            for t, off in enumerate(tap_offsets):
                start = lead + off
                patch_ref[t * cpad:(t + 1) * cpad, n * blk:(n + 1) * blk] = (
                    img[n, :, start:start + blk])

        # Encoder: ONE MXU matmul, K = 9*Cp, over both images at once.
        h = jnp.dot(w1_ref[...], patch_ref[...],
                    preferred_element_type=jnp.float32)          # [HID, N*blk]
        h = jnp.maximum(h + b1_ref[...], 0.0).astype(jnp.bfloat16)

        # Decoder: 1x1 conv == channel matmul; done per image so the output is
        # already [N, NCp, blk] (batch-major, no transpose needed outside).
        for n in range(n_img):
            logits = jnp.dot(w2_ref[...], h[:, n * blk:(n + 1) * blk],
                             preferred_element_type=jnp.float32) + b2_ref[...]
            out_ref[n] = logits.astype(out_ref.dtype)

    return kernel


def prepare_params(w1_hwio, b1, w2_hwio, b2):
    """One-time weight layout prep (call at model setup, not per forward)."""
    KH, KW, C, HID = w1_hwio.shape
    NC = w2_hwio.shape[-1]
    assert (KH, KW) == (3, 3), "encoder is a 3x3 conv"
    assert w2_hwio.shape[:2] == (1, 1), "decoder is a 1x1 conv"

    Cp = _round_up(max(C, 1), 16)      # bf16 sublane tile = 16
    NCp = _round_up(max(NC, 1), 8)     # f32 sublane tile  = 8

    # merged encoder weights: [HID, 9*Cp], row block t*Cp+c = tap t, channel c
    w1p = jnp.pad(w1_hwio, ((0, 0), (0, 0), (0, Cp - C), (0, 0)))  # [3,3,Cp,HID]
    w1m = jnp.transpose(w1p.reshape(KH * KW * Cp, HID)).astype(jnp.bfloat16)
    # decoder weights: [NCp, HID]
    w2m = jnp.transpose(
        jnp.pad(w2_hwio.reshape(HID, NC), ((0, 0), (0, NCp - NC)))
    ).astype(jnp.bfloat16)
    b1c = b1.reshape(HID, 1).astype(jnp.float32)
    b2c = jnp.pad(b2, (0, NCp - NC)).reshape(NCp, 1).astype(jnp.float32)
    return w1m, b1c, w2m, b2c


def encoder_decoder_forward(x_nchw, w1m, b1c, w2m, b2c, *, num_classes):
    """x_nchw: [N, C, H, W] float32 -> logits [N, num_classes, H, W]."""
    N, C, H, W = x_nchw.shape
    HID, k9cp = w1m.shape
    NCp = w2m.shape[0]
    Cp = k9cp // 9
    NC = num_classes

    Hp, Wp = H + 2, W + 2
    m_img = Hp * Wp                       # padded-grid positions per image
    blk = _round_up(m_img, 128)           # per-image lane block (lane-dense)
    halo = Wp + 1                         # max |tap offset| on the flat grid
    lead = halo
    E = _round_up(blk + 2 * halo, 128)    # per-image extended lane buffer

    # tap (dh, dw) reads flat index q + (dh-1)*Wp + (dw-1) on the padded grid
    tap_offsets = tuple((dh - 1) * Wp + (dw - 1)
                        for dh in range(3) for dw in range(3))

    # ---- cheap JAX glue: cast + pad (channels, spatial ring, lane halo) ----
    xb = x_nchw.astype(jnp.bfloat16)
    x_pad = jnp.pad(xb, ((0, 0), (0, Cp - C), (1, 1), (1, 1)))   # [N,Cp,Hp,Wp]
    x_ext = jnp.pad(x_pad.reshape(N, Cp, m_img),
                    ((0, 0), (0, 0), (lead, E - m_img - lead)))  # [N,Cp,E]

    kernel = _make_kernel(tap_offsets, N, Cp, blk, lead)

    out = pl.pallas_call(
        kernel,
        out_shape=jax.ShapeDtypeStruct((N, NCp, blk), jnp.float32),
        grid_spec=pltpu.PrefetchScalarGridSpec(
            num_scalar_prefetch=0,
            grid=(1,),  # single step: whole (tiny) batch in one invocation
            in_specs=[
                pl.BlockSpec((N, Cp, E), lambda i: (0, 0, 0)),       # images
                pl.BlockSpec((HID, 9 * Cp), lambda i: (0, 0)),       # enc W
                pl.BlockSpec((HID, 1), lambda i: (0, 0)),            # enc b
                pl.BlockSpec((NCp, HID), lambda i: (0, 0)),          # dec W
                pl.BlockSpec((NCp, 1), lambda i: (0, 0)),            # dec b
            ],
            out_specs=pl.BlockSpec((N, NCp, blk), lambda i: (0, 0, 0)),
            scratch_shapes=[pltpu.VMEM((9 * Cp, N * blk), jnp.bfloat16)],
        ),
        compiler_params=pltpu.CompilerParams(
            dimension_semantics=("arbitrary",)),
    )(x_ext, w1m, b1c, w2m, b2c)

    # drop padded classes, per-image lane padding, and the conv padding ring
    out = out[:, :NC, :m_img].reshape(N, NC, Hp, Wp)[:, :, 1:H + 1, 1:W + 1]
    return out


def ref_forward(x_nchw, w1_hwio, b1, w2_hwio, b2):
    """Pure-JAX f32 reference (lax convs) for numerical verification."""
    x = jnp.transpose(x_nchw, (0, 2, 3, 1))
    h = lax.conv_general_dilated(
        x, w1_hwio, window_strides=(1, 1), padding="SAME",
        dimension_numbers=("NHWC", "HWIO", "NHWC")) + b1
    h = jnp.maximum(h, 0.0)
    o = lax.conv_general_dilated(
        h, w2_hwio, window_strides=(1, 1), padding="SAME",
        dimension_numbers=("NHWC", "HWIO", "NHWC")) + b2
    return jnp.transpose(o, (0, 3, 1, 2))


if __name__ == "__main__":
    N, C, H, W = 2, 4, 16, 16
    HID, NUM_CLASSES = 32, 4

    key = jax.random.PRNGKey(0)
    kx, k1, kb1, k2, kb2 = jax.random.split(key, 5)

    x = jax.random.normal(kx, (N, C, H, W), dtype=jnp.float32)
    w1 = jax.random.normal(k1, (3, 3, C, HID), dtype=jnp.float32) * 0.1   # HWIO
    b1 = jax.random.normal(kb1, (HID,), dtype=jnp.float32) * 0.1
    w2 = jax.random.normal(k2, (1, 1, HID, NUM_CLASSES), dtype=jnp.float32) * 0.1
    b2 = jax.random.normal(kb2, (NUM_CLASSES,), dtype=jnp.float32) * 0.1

    # one-time weight layout prep (outside the per-call forward path)
    params = jax.block_until_ready(prepare_params(w1, b1, w2, b2))

    fwd = jax.jit(functools.partial(encoder_decoder_forward,
                                    num_classes=NUM_CLASSES))
    logits = jax.block_until_ready(fwd(x, *params))

    ref = jax.block_until_ready(ref_forward(x, w1, b1, w2, b2))
    assert logits.shape == (N, NUM_CLASSES, H, W)
    # bf16 inputs/weights on the MXU path -> relaxed tolerance vs. f32 reference
    assert jnp.allclose(logits, ref, atol=3e-2, rtol=3e-2), "mismatch vs reference"

    print("KERNEL_OK")
</pallas_src>

<mosaic_0001>
module attributes {stable_mosaic.version = 11 : i64} {
  func.func @kernel(%arg0: i32, %arg1: memref<2x16x512xbf16, #tpu.memory_space<vmem>>, %arg2: memref<32x144xbf16, #tpu.memory_space<vmem>>, %arg3: memref<32x1xf32, #tpu.memory_space<vmem>>, %arg4: memref<8x32xbf16, #tpu.memory_space<vmem>>, %arg5: memref<8x1xf32, #tpu.memory_space<vmem>>, %arg6: memref<2x8x384xf32, #tpu.memory_space<vmem>>, %arg7: memref<144x768xbf16, #tpu.memory_space<vmem>>) attributes {dimension_semantics = [#tpu.dimension_semantics<arbitrary>], iteration_bounds = array<i64: 1>, scalar_prefetch = 0 : i64, scratch_operands = 1 : i64, tpu.core_type = #tpu.core_type<tc>, window_params = [{pipeline_mode = #tpu.pipeline_mode<synchronous>, transform_indices = @transform_0, window_bounds = array<i64: 2, 16, 512>}, {pipeline_mode = #tpu.pipeline_mode<synchronous>, transform_indices = @transform_1, window_bounds = array<i64: 32, 144>}, {pipeline_mode = #tpu.pipeline_mode<synchronous>, transform_indices = @transform_2, window_bounds = array<i64: 32, 1>}, {pipeline_mode = #tpu.pipeline_mode<synchronous>, transform_indices = @transform_3, window_bounds = array<i64: 8, 32>}, {pipeline_mode = #tpu.pipeline_mode<synchronous>, transform_indices = @transform_4, window_bounds = array<i64: 8, 1>}, {pipeline_mode = #tpu.pipeline_mode<synchronous>, transform_indices = @transform_5, window_bounds = array<i64: 2, 8, 384>}]} {
    %c0 = arith.constant 0 : index
    %c0_0 = arith.constant 0 : index
    %c0_1 = arith.constant 0 : index
    %0 = vector.load %arg1[%c0, %c0_0, %c0_1] : memref<2x16x512xbf16, #tpu.memory_space<vmem>>, vector<2x16x512xbf16>
    %1 = vector.extract_strided_slice %0 {offsets = [0, 0, 0], sizes = [1, 16, 384], strides = [1, 1, 1]} : vector<2x16x512xbf16> to vector<1x16x384xbf16>
    %2 = vector.shape_cast %1 : vector<1x16x384xbf16> to vector<16x384xbf16>
    %c0_2 = arith.constant 0 : index
    %c0_3 = arith.constant 0 : index
    %3 = vector.load %arg7[%c0_2, %c0_3] : memref<144x768xbf16, #tpu.memory_space<vmem>>, vector<16x384xbf16>
    tpu.vector_store %arg7[%c0_2, %c0_3], %2 {strides = array<i32>} : memref<144x768xbf16, #tpu.memory_space<vmem>>, vector<16x384xbf16>,
    %4 = vector.extract_strided_slice %0 {offsets = [0, 0, 1], sizes = [1, 16, 384], strides = [1, 1, 1]} : vector<2x16x512xbf16> to vector<1x16x384xbf16>
    %5 = vector.shape_cast %4 : vector<1x16x384xbf16> to vector<16x384xbf16>
    %c16 = arith.constant 16 : index
    %c0_4 = arith.constant 0 : index
    %6 = vector.load %arg7[%c16, %c0_4] : memref<144x768xbf16, #tpu.memory_space<vmem>>, vector<16x384xbf16>
    tpu.vector_store %arg7[%c16, %c0_4], %5 {strides = array<i32>} : memref<144x768xbf16, #tpu.memory_space<vmem>>, vector<16x384xbf16>,
    %7 = vector.extract_strided_slice %0 {offsets = [0, 0, 2], sizes = [1, 16, 384], strides = [1, 1, 1]} : vector<2x16x512xbf16> to vector<1x16x384xbf16>
    %8 = vector.shape_cast %7 : vector<1x16x384xbf16> to vector<16x384xbf16>
    %c32 = arith.constant 32 : index
    %c0_5 = arith.constant 0 : index
    %9 = vector.load %arg7[%c32, %c0_5] : memref<144x768xbf16, #tpu.memory_space<vmem>>, vector<16x384xbf16>
    tpu.vector_store %arg7[%c32, %c0_5], %8 {strides = array<i32>} : memref<144x768xbf16, #tpu.memory_space<vmem>>, vector<16x384xbf16>,
    %10 = vector.extract_strided_slice %0 {offsets = [0, 0, 18], sizes = [1, 16, 384], strides = [1, 1, 1]} : vector<2x16x512xbf16> to vector<1x16x384xbf16>
    %11 = vector.shape_cast %10 : vector<1x16x384xbf16> to vector<16x384xbf16>
    %c48 = arith.constant 48 : index
    %c0_6 = arith.constant 0 : index
    %12 = vector.load %arg7[%c48, %c0_6] : memref<144x768xbf16, #tpu.memory_space<vmem>>, vector<16x384xbf16>
    tpu.vector_store %arg7[%c48, %c0_6], %11 {strides = array<i32>} : memref<144x768xbf16, #tpu.memory_space<vmem>>, vector<16x384xbf16>,
    %13 = vector.extract_strided_slice %0 {offsets = [0, 0, 19], sizes = [1, 16, 384], strides = [1, 1, 1]} : vector<2x16x512xbf16> to vector<1x16x384xbf16>
    %14 = vector.shape_cast %13 : vector<1x16x384xbf16> to vector<16x384xbf16>
    %c64 = arith.constant 64 : index
    %c0_7 = arith.constant 0 : index
    %15 = vector.load %arg7[%c64, %c0_7] : memref<144x768xbf16, #tpu.memory_space<vmem>>, vector<16x384xbf16>
    tpu.vector_store %arg7[%c64, %c0_7], %14 {strides = array<i32>} : memref<144x768xbf16, #tpu.memory_space<vmem>>, vector<16x384xbf16>,
    %16 = vector.extract_strided_slice %0 {offsets = [0, 0, 20], sizes = [1, 16, 384], strides = [1, 1, 1]} : vector<2x16x512xbf16> to vector<1x16x384xbf16>
    %17 = vector.shape_cast %16 : vector<1x16x384xbf16> to vector<16x384xbf16>
    %c80 = arith.constant 80 : index
    %c0_8 = arith.constant 0 : index
    %18 = vector.load %arg7[%c80, %c0_8] : memref<144x768xbf16, #tpu.memory_space<vmem>>, vector<16x384xbf16>
    tpu.vector_store %arg7[%c80, %c0_8], %17 {strides = array<i32>} : memref<144x768xbf16, #tpu.memory_space<vmem>>, vector<16x384xbf16>,
    %19 = vector.extract_strided_slice %0 {offsets = [0, 0, 36], sizes = [1, 16, 384], strides = [1, 1, 1]} : vector<2x16x512xbf16> to vector<1x16x384xbf16>
    %20 = vector.shape_cast %19 : vector<1x16x384xbf16> to vector<16x384xbf16>
    %c96 = arith.constant 96 : index
    %c0_9 = arith.constant 0 : index
    %21 = vector.load %arg7[%c96, %c0_9] : memref<144x768xbf16, #tpu.memory_space<vmem>>, vector<16x384xbf16>
    tpu.vector_store %arg7[%c96, %c0_9], %20 {strides = array<i32>} : memref<144x768xbf16, #tpu.memory_space<vmem>>, vector<16x384xbf16>,
    %22 = vector.extract_strided_slice %0 {offsets = [0, 0, 37], sizes = [1, 16, 384], strides = [1, 1, 1]} : vector<2x16x512xbf16> to vector<1x16x384xbf16>
    %23 = vector.shape_cast %22 : vector<1x16x384xbf16> to vector<16x384xbf16>
    %c112 = arith.constant 112 : index
    %c0_10 = arith.constant 0 : index
    %24 = vector.load %arg7[%c112, %c0_10] : memref<144x768xbf16, #tpu.memory_space<vmem>>, vector<16x384xbf16>
    tpu.vector_store %arg7[%c112, %c0_10], %23 {strides = array<i32>} : memref<144x768xbf16, #tpu.memory_space<vmem>>, vector<16x384xbf16>,
    %25 = vector.extract_strided_slice %0 {offsets = [0, 0, 38], sizes = [1, 16, 384], strides = [1, 1, 1]} : vector<2x16x512xbf16> to vector<1x16x384xbf16>
    %26 = vector.shape_cast %25 : vector<1x16x384xbf16> to vector<16x384xbf16>
    %c128 = arith.constant 128 : index
    %c0_11 = arith.constant 0 : index
    %27 = vector.load %arg7[%c128, %c0_11] : memref<144x768xbf16, #tpu.memory_space<vmem>>, vector<16x384xbf16>
    tpu.vector_store %arg7[%c128, %c0_11], %26 {strides = array<i32>} : memref<144x768xbf16, #tpu.memory_space<vmem>>, vector<16x384xbf16>,
    %28 = vector.extract_strided_slice %0 {offsets = [1, 0, 0], sizes = [1, 16, 384], strides = [1, 1, 1]} : vector<2x16x512xbf16> to vector<1x16x384xbf16>
    %29 = vector.shape_cast %28 : vector<1x16x384xbf16> to vector<16x384xbf16>
    %c0_12 = arith.constant 0 : index
    %c384 = arith.constant 384 : index
    %30 = vector.load %arg7[%c0_12, %c384] : memref<144x768xbf16, #tpu.memory_space<vmem>>, vector<16x384xbf16>
    tpu.vector_store %arg7[%c0_12, %c384], %29 {strides = array<i32>} : memref<144x768xbf16, #tpu.memory_space<vmem>>, vector<16x384xbf16>,
    %31 = vector.extract_strided_slice %0 {offsets = [1, 0, 1], sizes = [1, 16, 384], strides = [1, 1, 1]} : vector<2x16x512xbf16> to vector<1x16x384xbf16>
    %32 = vector.shape_cast %31 : vector<1x16x384xbf16> to vector<16x384xbf16>
    %c16_13 = arith.constant 16 : index
    %c384_14 = arith.constant 384 : index
    %33 = vector.load %arg7[%c16_13, %c384_14] : memref<144x768xbf16, #tpu.memory_space<vmem>>, vector<16x384xbf16>
    tpu.vector_store %arg7[%c16_13, %c384_14], %32 {strides = array<i32>} : memref<144x768xbf16, #tpu.memory_space<vmem>>, vector<16x384xbf16>,
    %34 = vector.extract_strided_slice %0 {offsets = [1, 0, 2], sizes = [1, 16, 384], strides = [1, 1, 1]} : vector<2x16x512xbf16> to vector<1x16x384xbf16>
    %35 = vector.shape_cast %34 : vector<1x16x384xbf16> to vector<16x384xbf16>
    %c32_15 = arith.constant 32 : index
    %c384_16 = arith.constant 384 : index
    %36 = vector.load %arg7[%c32_15, %c384_16] : memref<144x768xbf16, #tpu.memory_space<vmem>>, vector<16x384xbf16>
    tpu.vector_store %arg7[%c32_15, %c384_16], %35 {strides = array<i32>} : memref<144x768xbf16, #tpu.memory_space<vmem>>, vector<16x384xbf16>,
    %37 = vector.extract_strided_slice %0 {offsets = [1, 0, 18], sizes = [1, 16, 384], strides = [1, 1, 1]} : vector<2x16x512xbf16> to vector<1x16x384xbf16>
    %38 = vector.shape_cast %37 : vector<1x16x384xbf16> to vector<16x384xbf16>
    %c48_17 = arith.constant 48 : index
    %c384_18 = arith.constant 384 : index
    %39 = vector.load %arg7[%c48_17, %c384_18] : memref<144x768xbf16, #tpu.memory_space<vmem>>, vector<16x384xbf16>
    tpu.vector_store %arg7[%c48_17, %c384_18], %38 {strides = array<i32>} : memref<144x768xbf16, #tpu.memory_space<vmem>>, vector<16x384xbf16>,
    %40 = vector.extract_strided_slice %0 {offsets = [1, 0, 19], sizes = [1, 16, 384], strides = [1, 1, 1]} : vector<2x16x512xbf16> to vector<1x16x384xbf16>
    %41 = vector.shape_cast %40 : vector<1x16x384xbf16> to vector<16x384xbf16>
    %c64_19 = arith.constant 64 : index
    %c384_20 = arith.constant 384 : index
    %42 = vector.load %arg7[%c64_19, %c384_20] : memref<144x768xbf16, #tpu.memory_space<vmem>>, vector<16x384xbf16>
    tpu.vector_store %arg7[%c64_19, %c384_20], %41 {strides = array<i32>} : memref<144x768xbf16, #tpu.memory_space<vmem>>, vector<16x384xbf16>,
    %43 = vector.extract_strided_slice %0 {offsets = [1, 0, 20], sizes = [1, 16, 384], strides = [1, 1, 1]} : vector<2x16x512xbf16> to vector<1x16x384xbf16>
    %44 = vector.shape_cast %43 : vector<1x16x384xbf16> to vector<16x384xbf16>
    %c80_21 = arith.constant 80 : index
    %c384_22 = arith.constant 384 : index
    %45 = vector.load %arg7[%c80_21, %c384_22] : memref<144x768xbf16, #tpu.memory_space<vmem>>, vector<16x384xbf16>
    tpu.vector_store %arg7[%c80_21, %c384_22], %44 {strides = array<i32>} : memref<144x768xbf16, #tpu.memory_space<vmem>>, vector<16x384xbf16>,
    %46 = vector.extract_strided_slice %0 {offsets = [1, 0, 36], sizes = [1, 16, 384], strides = [1, 1, 1]} : vector<2x16x512xbf16> to vector<1x16x384xbf16>
    %47 = vector.shape_cast %46 : vector<1x16x384xbf16> to vector<16x384xbf16>
    %c96_23 = arith.constant 96 : index
    %c384_24 = arith.constant 384 : index
    %48 = vector.load %arg7[%c96_23, %c384_24] : memref<144x768xbf16, #tpu.memory_space<vmem>>, vector<16x384xbf16>
    tpu.vector_store %arg7[%c96_23, %c384_24], %47 {strides = array<i32>} : memref<144x768xbf16, #tpu.memory_space<vmem>>, vector<16x384xbf16>,
    %49 = vector.extract_strided_slice %0 {offsets = [1, 0, 37], sizes = [1, 16, 384], strides = [1, 1, 1]} : vector<2x16x512xbf16> to vector<1x16x384xbf16>
    %50 = vector.shape_cast %49 : vector<1x16x384xbf16> to vector<16x384xbf16>
    %c112_25 = arith.constant 112 : index
    %c384_26 = arith.constant 384 : index
    %51 = vector.load %arg7[%c112_25, %c384_26] : memref<144x768xbf16, #tpu.memory_space<vmem>>, vector<16x384xbf16>
    tpu.vector_store %arg7[%c112_25, %c384_26], %50 {strides = array<i32>} : memref<144x768xbf16, #tpu.memory_space<vmem>>, vector<16x384xbf16>,
    %52 = vector.extract_strided_slice %0 {offsets = [1, 0, 38], sizes = [1, 16, 384], strides = [1, 1, 1]} : vector<2x16x512xbf16> to vector<1x16x384xbf16>
    %53 = vector.shape_cast %52 : vector<1x16x384xbf16> to vector<16x384xbf16>
    %c128_27 = arith.constant 128 : index
    %c384_28 = arith.constant 384 : index
    %54 = vector.load %arg7[%c128_27, %c384_28] : memref<144x768xbf16, #tpu.memory_space<vmem>>, vector<16x384xbf16>
    tpu.vector_store %arg7[%c128_27, %c384_28], %53 {strides = array<i32>} : memref<144x768xbf16, #tpu.memory_space<vmem>>, vector<16x384xbf16>,
    %c0_29 = arith.constant 0 : index
    %c0_30 = arith.constant 0 : index
    %55 = vector.load %arg2[%c0_29, %c0_30] : memref<32x144xbf16, #tpu.memory_space<vmem>>, vector<32x144xbf16>
    %c0_31 = arith.constant 0 : index
    %c0_32 = arith.constant 0 : index
    %56 = vector.load %arg7[%c0_31, %c0_32] : memref<144x768xbf16, #tpu.memory_space<vmem>>, vector<144x768xbf16>
    %cst = arith.constant dense<0.000000e+00> : vector<32x768xf32>
    %57 = tpu.matmul %55, %56, %cst {dimension_numbers = #tpu.dot_dimension_numbers<[1], [0], [0], [1], [0, 0, 1, 1], [], []>} : vector<32x144xbf16>, vector<144x768xbf16>, vector<32x768xf32> -> vector<32x768xf32>
    %c0_33 = arith.constant 0 : index
    %c0_34 = arith.constant 0 : index
    %58 = vector.load %arg3[%c0_33, %c0_34] : memref<32x1xf32, #tpu.memory_space<vmem>>, vector<32x1xf32>
    %59 = vector.broadcast %58 : vector<32x1xf32> to vector<32x768xf32>
    %60 = arith.addf %57, %59 : vector<32x768xf32>
    %cst_35 = arith.constant 0.000000e+00 : f32
    %61 = vector.broadcast %cst_35 : f32 to vector<32x768xf32>
    %62 = arith.maximumf %60, %61 : vector<32x768xf32>
    %63 = arith.truncf %62 : vector<32x768xf32> to vector<32x768xbf16>
    %c0_36 = arith.constant 0 : index
    %c0_37 = arith.constant 0 : index
    %64 = vector.load %arg4[%c0_36, %c0_37] : memref<8x32xbf16, #tpu.memory_space<vmem>>, vector<8x32xbf16>
    %65 = vector.extract_strided_slice %63 {offsets = [0, 0], sizes = [32, 384], strides = [1, 1]} : vector<32x768xbf16> to vector<32x384xbf16>
    %cst_38 = arith.constant dense<0.000000e+00> : vector<8x384xf32>
    %66 = tpu.matmul %64, %65, %cst_38 {dimension_numbers = #tpu.dot_dimension_numbers<[1], [0], [0], [1], [0, 0, 1, 1], [], []>} : vector<8x32xbf16>, vector<32x384xbf16>, vector<8x384xf32> -> vector<8x384xf32>
    %c0_39 = arith.constant 0 : index
    %c0_40 = arith.constant 0 : index
    %67 = vector.load %arg5[%c0_39, %c0_40] : memref<8x1xf32, #tpu.memory_space<vmem>>, vector<8x1xf32>
    %68 = vector.broadcast %67 : vector<8x1xf32> to vector<8x384xf32>
    %69 = arith.addf %66, %68 : vector<8x384xf32>
    %c0_41 = arith.constant 0 : index
    %c0_42 = arith.constant 0 : index
    %c0_43 = arith.constant 0 : index
    %70 = vector.load %arg6[%c0_41, %c0_42, %c0_43] : memref<2x8x384xf32, #tpu.memory_space<vmem>>, vector<1x8x384xf32>
    %71 = vector.shape_cast %70 : vector<1x8x384xf32> to vector<8x384xf32>
    %72 = vector.shape_cast %69 : vector<8x384xf32> to vector<1x8x384xf32>
    tpu.vector_store %arg6[%c0_41, %c0_42, %c0_43], %72 {strides = array<i32>} : memref<2x8x384xf32, #tpu.memory_space<vmem>>, vector<1x8x384xf32>,
    %c0_44 = arith.constant 0 : index
    %c0_45 = arith.constant 0 : index
    %73 = vector.load %arg4[%c0_44, %c0_45] : memref<8x32xbf16, #tpu.memory_space<vmem>>, vector<8x32xbf16>
    %74 = vector.extract_strided_slice %63 {offsets = [0, 384], sizes = [32, 384], strides = [1, 1]} : vector<32x768xbf16> to vector<32x384xbf16>
    %cst_46 = arith.constant dense<0.000000e+00> : vector<8x384xf32>
    %75 = tpu.matmul %73, %74, %cst_46 {dimension_numbers = #tpu.dot_dimension_numbers<[1], [0], [0], [1], [0, 0, 1, 1], [], []>} : vector<8x32xbf16>, vector<32x384xbf16>, vector<8x384xf32> -> vector<8x384xf32>
    %c0_47 = arith.constant 0 : index
    %c0_48 = arith.constant 0 : index
    %76 = vector.load %arg5[%c0_47, %c0_48] : memref<8x1xf32, #tpu.memory_space<vmem>>, vector<8x1xf32>
    %77 = vector.broadcast %76 : vector<8x1xf32> to vector<8x384xf32>
    %78 = arith.addf %75, %77 : vector<8x384xf32>
    %c1 = arith.constant 1 : index
    %c0_49 = arith.constant 0 : index
    %c0_50 = arith.constant 0 : index
    %79 = vector.load %arg6[%c1, %c0_49, %c0_50] : memref<2x8x384xf32, #tpu.memory_space<vmem>>, vector<1x8x384xf32>
    %80 = vector.shape_cast %79 : vector<1x8x384xf32> to vector<8x384xf32>
    %81 = vector.shape_cast %78 : vector<8x384xf32> to vector<1x8x384xf32>
    tpu.vector_store %arg6[%c1, %c0_49, %c0_50], %81 {strides = array<i32>} : memref<2x8x384xf32, #tpu.memory_space<vmem>>, vector<1x8x384xf32>,
    return
  }
  func.func @transform_0(%arg0: i32) -> (i32, i32, i32) {
    %c0_i32 = arith.constant 0 : i32
    %c0_i32_0 = arith.constant 0 : i32
    %c0_i32_1 = arith.constant 0 : i32
    %c0_i32_2 = arith.constant 0 : i32
    return %c0_i32, %c0_i32_0, %c0_i32_1 : i32, i32, i32
  }
  func.func @transform_1(%arg0: i32) -> (i32, i32) {
    %c0_i32 = arith.constant 0 : i32
    %c0_i32_0 = arith.constant 0 : i32
    %c0_i32_1 = arith.constant 0 : i32
    return %c0_i32, %c0_i32_0 : i32, i32
  }
  func.func @transform_2(%arg0: i32) -> (i32, i32) {
    %c0_i32 = arith.constant 0 : i32
    %c0_i32_0 = arith.constant 0 : i32
    %c0_i32_1 = arith.constant 0 : i32
    return %c0_i32, %c0_i32_0 : i32, i32
  }
  func.func @transform_3(%arg0: i32) -> (i32, i32) {
    %c0_i32 = arith.constant 0 : i32
    %c0_i32_0 = arith.constant 0 : i32
    %c0_i32_1 = arith.constant 0 : i32
    return %c0_i32, %c0_i32_0 : i32, i32
  }
  func.func @transform_4(%arg0: i32) -> (i32, i32) {
    %c0_i32 = arith.constant 0 : i32
    %c0_i32_0 = arith.constant 0 : i32
    %c0_i32_1 = arith.constant 0 : i32
    return %c0_i32, %c0_i32_0 : i32, i32
  }
  func.func @transform_5(%arg0: i32) -> (i32, i32, i32) {
    %c0_i32 = arith.constant 0 : i32
    %c0_i32_0 = arith.constant 0 : i32
    %c0_i32_1 = arith.constant 0 : i32
    %c0_i32_2 = arith.constant 0 : i32
    return %c0_i32, %c0_i32_0, %c0_i32_1 : i32, i32, i32
  }
}

</mosaic_0001>

<bundles_post_ra>
// kernel: encoder_decoder_forward.1
= control target key start
LH: loop header
LB: loop body
LE: loop exit
PB: predicated region body
PF: predicated region fallthrough
CT: control target
= control target key end

     0   :  { %s1604_s22 = smov 91   ;;  %s1605_s25 = smov 92   ;;  %vm49_vm0 = vcmask 1043456   ;;  %vm186_vm1 = vcmask 752640   ;;  %vm159_vm2 = vcmask 883712   ;;  %vm213_vm3 = vcmask 744448   ;;  %s2113_s0 = inlined_call_operand.vmem [shape: bf16[2,16,512], index: 0, kind: input, shape index: {}]   ;;  %s2114_s1 = inlined_call_operand.vmem [shape: bf16[32,144], index: 1, kind: input, shape index: {}]   ;;  %s2115_s2 = inlined_call_operand.vmem [shape: f32[32,1], index: 2, kind: input, shape index: {}]   ;;  %s2116_s4 = inlined_call_operand.vmem [shape: f32[8,1], index: 4, kind: input, shape index: {}]   ;;  %s2117_s3 = inlined_call_operand.vmem [shape: bf16[8,32], index: 3, kind: input, shape index: {}]   ;;  %s2118_s5 = inlined_call_operand.vmem [shape: f32[2,8,384], index: 5, kind: output, shape index: {}]  }
   0x1   :  { %v23_v0 = vld [vmem:[%s2113_s0 + $0x10] sm:$0xff]  ;;  %v21_v1 = vld [vmem:[%s2113_s0] sm:$0xff]  ;;  %v24_v2 = vld [vmem:[%s2113_s0 + $0x18] sm:$0xff]  ;;  %s1606_s28 = smov 108   ;;  %s1607_s29 = smov 109   ;;  %vm105_vm4 = vcmask 900096  }
   0x2   :  { %204 = vrot.lane.b32.xlu1 %v23_v0, %s1604_s22  ;;  %31 = vst [vmem:[#allocation2 + $0x18] sm:$0xff] %v23_v0  ;;  %200 = vrot.lane.b32.xlu0 %v21_v1, %s1604_s22  ;;  %v22_v3 = vld [vmem:[%s2113_s0 + $0x8] sm:$0xff]  ;;  %s1608_s30 = smov 110   ;;  %v1678_v4 = vld [vmem:[%s2113_s0 + $0x30] sm:$0xff]  ;;  %s1609_s8 = smov 126   ;;  %vm132_vm5 = vcmask 891904  }
   0x3   :  { %29 = vst [vmem:[#allocation2] sm:$0xff] %v21_v1  ;;  %173 = vrot.lane.b32.xlu2 %v21_v1, %s1605_s25  ;;  %v1685_v5 = vld [vmem:[%s2113_s0 + $0x28] sm:$0xff]  ;;  %v1694_v6 = vld [vmem:[%s2113_s0 + $0x20] sm:$0xff]  ;;  %s1610_s13 = smov 127   ;;  %v1703_v7 = vld [vmem:[%s2113_s0 + $0x38] sm:$0xff]  ;;  %s1611_s16 = smov 90  }
   0x4   :  { %32 = vst [vmem:[#allocation2 + $0x20] sm:$0xf] %v24_v2  ;;  %vm78_vm6 = vcmask 1031168   ;;  %vm240_vm7 = vcmask 736256   ;;  %vm51_vm8 = vcmask 1039360   ;;  %vm840_vm9 = vcmask 130048  }
   0x5   :  { %30 = vst [vmem:[#allocation2 + $0x8] sm:$0xf] %v22_v3  ;;  %vm1150_vm10 = vcmask 261120  }
   0x6   :  { %256 = vst [vmem:[#allocation2 + $0x24] sm:$0xff] %v1678_v4 }
   0x7   :  { %255 = vst [vmem:[#allocation2 + $0x14] sm:$0xf] %v1685_v5 }
   0x8   :  { %254 = vst [vmem:[#allocation2 + $0xc] sm:$0xff] %v1694_v6 }
   0x9   :  { %257 = vst [vmem:[#allocation2 + $0x2c] sm:$0xf] %v1703_v7 }
   0xa   :  { %206 = vrot.lane.b32.xlu1 %v24_v2, %s1604_s22  ;;  %202 = vrot.lane.b32.xlu0 %v22_v3, %s1604_s22 }
   0xb   :  { %175 = vrot.lane.b32.xlu2 %v22_v3, %s1605_s25 }
  0x12   :  { %179 = vrot.lane.b32.xlu1 %v24_v2, %s1605_s25  ;;  %177 = vrot.lane.b32.xlu0 %v23_v0, %s1605_s25 }
  0x13   :  { %146 = vrot.lane.b32.xlu2 %v21_v1, %s1606_s28 }
  0x1a   :  { %150 = vrot.lane.b32.xlu1 %v23_v0, %s1606_s28  ;;  %148 = vrot.lane.b32.xlu0 %v22_v3, %s1606_s28 }
  0x1b   :  { %152 = vrot.lane.b32.xlu2 %v24_v2, %s1606_s28 }
  0x22   :  { %121 = vrot.lane.b32.xlu1 %v22_v3, %s1607_s29  ;;  %119 = vrot.lane.b32.xlu0 %v21_v1, %s1607_s29 }
  0x23   :  { %123 = vrot.lane.b32.xlu2 %v23_v0, %s1607_s29 }
  0x2a   :  { %92 = vrot.lane.b32.xlu1 %v21_v1, %s1608_s30  ;;  %125 = vrot.lane.b32.xlu0 %v24_v2, %s1607_s29 }
  0x2b   :  { %94 = vrot.lane.b32.xlu2 %v22_v3, %s1608_s30 }
  0x32   :  { %98 = vrot.lane.b32.xlu1 %v24_v2, %s1608_s30  ;;  %96 = vrot.lane.b32.xlu0 %v23_v0, %s1608_s30 }
  0x33   :  { %65 = vrot.lane.b32.xlu2 %v21_v1, %s1609_s8 }
  0x3a   :  { %69 = vrot.lane.b32.xlu1 %v23_v0, %s1609_s8  ;;  %67 = vrot.lane.b32.xlu0 %v22_v3, %s1609_s8 }
  0x3b   :  { %71 = vrot.lane.b32.xlu2 %v24_v2, %s1609_s8 }
  0x42   :  { %39 = vrot.lane.b32.xlu1 %v22_v3, %s1610_s13  ;;  %37 = vrot.lane.b32.xlu0 %v21_v1, %s1610_s13 }
  0x43   :  { %41 = vrot.lane.b32.xlu2 %v23_v0, %s1610_s13 }
  0x4a   :  { %227 = vrot.lane.b32.xlu1 %v21_v1, %s1611_s16  ;;  %43 = vrot.lane.b32.xlu0 %v24_v2, %s1610_s13 }
  0x4b   :  { %229 = vrot.lane.b32.xlu2 %v22_v3, %s1611_s16 }
  0x52   :  { %233 = vrot.lane.b32.xlu1 %v24_v2, %s1611_s16  ;;  %231 = vrot.lane.b32.xlu0 %v23_v0, %s1611_s16 }
  0x53   :  { %418 = vrot.lane.b32.xlu2 %v1694_v6, %s1604_s22 }
  0x5a   :  { %422 = vrot.lane.b32.xlu1 %v1678_v4, %s1604_s22  ;;  %420 = vrot.lane.b32.xlu0 %v1685_v5, %s1604_s22 }
  0x5b   :  { %424 = vrot.lane.b32.xlu2 %v1703_v7, %s1604_s22 }
  0x5d   :  { %v174_v8 = vpop.permute.xlu2 %173 }
  0x5e   :  { %v181_v9 = vrot.slane %v174_v8, 4 }
  0x62   :  { %394 = vrot.lane.b32.xlu1 %v1685_v5, %s1605_s25  ;;  %392 = vrot.lane.b32.xlu0 %v1694_v6, %s1605_s25 }
  0x63   :  { %396 = vrot.lane.b32.xlu2 %v1678_v4, %s1605_s25 }
  0x65   :  { %v176_v10 = vpop.permute.xlu2 %175 }
  0x66   :  { %v182_v11 = vrot.slane %v176_v10, 4 }
  0x68   :  { %v185_v12 = vsel %vm49_vm0, %v181_v9, %v182_v11  ;;  %v188_v13 = vsel %vm186_vm1, %v176_v10, %v182_v11 }
  0x69   :  { %v187_v14 = vsel %vm186_vm1, %v174_v8, %v185_v12  ;;  %197 = vst [vmem:[#allocation2 + $0x128] sm:$0xf] %v188_v13 }
  0x6a   :  { %366 = vrot.lane.b32.xlu1 %v1694_v6, %s1606_s28  ;;  %398 = vrot.lane.b32.xlu0 %v1703_v7, %s1605_s25  ;;  %196 = vst [vmem:[#allocation2 + $0x120] sm:$0xff] %v187_v14 }
  0x6b   :  { %368 = vrot.lane.b32.xlu2 %v1685_v5, %s1606_s28 }
  0x6d   :  { %v1734_v15 = vpop.permute.xlu2 %146 }
  0x6e   :  { %v154_v50 = vrot.slane %v1734_v15, 4 }
  0x71   :  { %v1443_v59 = vld [vmem:[#allocation2 + $0x120] sm:$0xf]  ;;  %v1574_v60 = vld [vmem:[#allocation2 + $0x124] sm:$0xf] }
  0x72   :  { %372 = vrot.lane.b32.xlu1 %v1703_v7, %s1606_s28  ;;  %370 = vrot.lane.b32.xlu0 %v1678_v4, %s1606_s28 }
  0x73   :  { %340 = vrot.lane.b32.xlu2 %v1694_v6, %s1607_s29 }
  0x74   :  { %v205_v16 = vpop.permute.xlu1 %204  ;;  %v201_v17 = vpop.permute.xlu0 %200 }
  0x75   :  { %v153_v18 = vpop.permute.xlu2 %152  ;;  %v210_v21 = vrot.slane %v205_v16, 4  ;;  %v208_v24 = vrot.slane %v201_v17, 4 }
  0x76   :  { %v157_v19 = vrot.slane %v153_v18, 4 }
  0x78   :  { %v164_v20 = vsel %vm159_vm2, %v153_v18, %v157_v19 }
  0x79   :  { %172 = vst [vmem:[#allocation2 + $0x110] sm:$0xf] %v164_v20 }
  0x7a   :  { %344 = vrot.lane.b32.xlu1 %v1678_v4, %s1607_s29  ;;  %342 = vrot.lane.b32.xlu0 %v1685_v5, %s1607_s29 }
  0x7b   :  { %346 = vrot.lane.b32.xlu2 %v1703_v7, %s1607_s29 }
  0x7c   :  { %v207_v22 = vpop.permute.xlu1 %206  ;;  %v203_v23 = vpop.permute.xlu0 %202 }
  0x7d   :  { %v211_v25 = vrot.slane %v207_v22, 4  ;;  %v209_v26 = vrot.slane %v203_v23, 4  ;;  %v1749_v27 = vpop.permute.xlu2 %123 }
  0x7f   :  { %v216_v28 = vsel %vm49_vm0, %v210_v21, %v211_v25  ;;  %v218_v29 = vsel %vm213_vm3, %v207_v22, %v211_v25  ;;  %v212_v30 = vsel %vm49_vm0, %v208_v24, %v209_v26  ;;  %v215_v33 = vsel %vm213_vm3, %v203_v23, %v209_v26 }
  0x80   :  { %v217_v31 = vsel %vm213_vm3, %v205_v16, %v216_v28  ;;  %226 = vst [vmem:[#allocation2 + $0x170] sm:$0xf] %v218_v29  ;;  %v214_v32 = vsel %vm213_vm3, %v201_v17, %v212_v30  ;;  %v129_v23 = vrot.slane %v1749_v27, 4 }
  0x81   :  { %225 = vst [vmem:[#allocation2 + $0x168] sm:$0xff] %v217_v31 }
  0x82   :  { %223 = vst [vmem:[#allocation2 + $0x150] sm:$0xff] %v214_v32  ;;  %316 = vrot.lane.b32.xlu1 %v1685_v5, %s1608_s30  ;;  %314 = vrot.lane.b32.xlu0 %v1694_v6, %s1608_s30 }
  0x83   :  { %224 = vst [vmem:[#allocation2 + $0x158] sm:$0xf] %v215_v33  ;;  %318 = vrot.lane.b32.xlu2 %v1678_v4, %s1608_s30 }
  0x84   :  { %v180_v34 = vpop.permute.xlu1 %179  ;;  %v178_v35 = vpop.permute.xlu0 %177 }
  0x85   :  { %v184_v36 = vrot.slane %v180_v34, 4  ;;  %v183_v37 = vrot.slane %v178_v35, 4  ;;  %v1763_v38 = vpop.permute.xlu2 %94 }
  0x86   :  { %v101_v39 = vrot.slane %v1763_v38, 4 }
  0x87   :  { %v191_v40 = vsel %vm186_vm1, %v180_v34, %v184_v36  ;;  %v189_v41 = vsel %vm49_vm0, %v183_v37, %v184_v36 }
  0x88   :  { %199 = vst [vmem:[#allocation2 + $0x140] sm:$0xf] %v191_v40  ;;  %v190_v42 = vsel %vm186_vm1, %v178_v35, %v189_v41  ;;  %v1583_v43 = vld [vmem:[#allocation2 + $0x164] sm:$0xf0]  ;;  %v1469_v44 = vld [vmem:[#allocation2 + $0x168] sm:$0xf0]  ;;  %v107_v45 = vsel %vm105_vm4, %v1763_v38, %v101_v39 }
  0x89   :  { %198 = vst [vmem:[#allocation2 + $0x138] sm:$0xff] %v190_v42  ;;  %v1467_v46 = vld [vmem:[#allocation2 + $0x150] sm:$0xf]  ;;  %v1580_v47 = vld [vmem:[#allocation2 + $0x154] sm:$0xf] }
  0x8a   :  { %288 = vrot.lane.b32.xlu1 %v1694_v6, %s1609_s8  ;;  %320 = vrot.lane.b32.xlu0 %v1703_v7, %s1608_s30  ;;  %v1468_v48 = vor.u32 %v1583_v43, %v1467_v46  ;;  %v1472_v49 = vor.u32 %v1580_v47, %v1469_v44  ;;  %116 = vst [vmem:[#allocation2 + $0x98] sm:$0xf] %v107_v45 }
  0x8b   :  { %290 = vrot.lane.b32.xlu2 %v1685_v5, %s1609_s8 }
  0x8c   :  { %847 = vmatpush.bf16.msra.mxu0 %v1468_v48  ;;  %885 = vmatpush.bf16.msra.mxu2 %v1472_v49  ;;  %v151_v51 = vpop.permute.xlu1 %150  ;;  %v149_v52 = vpop.permute.xlu0 %148 }
  0x8d   :  { %v156_v53 = vrot.slane %v151_v51, 4  ;;  %v155_v54 = vrot.slane %v149_v52, 4  ;;  %v1780_v55 = vpop.permute.xlu2 %65 }
  0x8e   :  { %v73_v47 = vrot.slane %v1780_v55, 4 }
  0x8f   :  { %v162_v56 = vsel %vm49_vm0, %v156_v53, %v157_v19  ;;  %v158_v57 = vsel %vm49_vm0, %v154_v50, %v155_v54  ;;  %v161_v58 = vsel %vm159_vm2, %v149_v52, %v155_v54 }
  0x90   :  { %v163_v61 = vsel %vm159_vm2, %v151_v51, %v162_v56  ;;  %v160_v62 = vsel %vm159_vm2, %v1734_v15, %v158_v57  ;;  %170 = vst [vmem:[#allocation2 + $0xf8] sm:$0xf] %v161_v58  ;;  %v1577_v63 = vld [vmem:[#allocation2 + $0x134] sm:$0xf0]  ;;  %v1445_v0 = vld [vmem:[#allocation2 + $0x138] sm:$0xf0] }
  0x91   :  { %171 = vst [vmem:[#allocation2 + $0x108] sm:$0xff] %v163_v61  ;;  %v1444_v1 = vor.u32 %v1577_v63, %v1443_v59  ;;  %v1448_v2 = vor.u32 %v1574_v60, %v1445_v0 }
  0x92   :  { %169 = vst [vmem:[#allocation2 + $0xf0] sm:$0xff] %v160_v62  ;;  %294 = vrot.lane.b32.xlu1 %v1703_v7, %s1609_s8  ;;  %292 = vrot.lane.b32.xlu0 %v1678_v4, %s1609_s8 }
  0x93   :  { %848 = vmatpush.bf16.msra.mxu0 %v1444_v1  ;;  %886 = vmatpush.bf16.msra.mxu2 %v1448_v2 }
  0x94   :  { %v122_v3 = vpop.permute.xlu1 %121  ;;  %v120_v8 = vpop.permute.xlu0 %119  ;;  %262 = vrot.lane.b32.xlu2 %v1694_v6, %s1610_s13 }
  0x95   :  { %v128_v9 = vrot.slane %v122_v3, 4  ;;  %v127_v10 = vrot.slane %v120_v8, 4  ;;  %v1794_v11 = vpop.permute.xlu2 %71 }
  0x96   :  { %v76_v12 = vrot.slane %v1794_v11, 4 }
  0x97   :  { %v134_v13 = vsel %vm132_vm5, %v122_v3, %v128_v9  ;;  %v131_v14 = vsel %vm49_vm0, %v127_v10, %v128_v9 }
  0x98   :  { %143 = vst [vmem:[#allocation2 + $0xc8] sm:$0xf] %v134_v13  ;;  %v133_v15 = vsel %vm132_vm5, %v120_v8, %v131_v14  ;;  %v1571_v16 = vld [vmem:[#allocation2 + $0x104] sm:$0xf0]  ;;  %v1421_v17 = vld [vmem:[#allocation2 + $0x108] sm:$0xf0]  ;;  %v83_v18 = vsel %vm78_vm6, %v1794_v11, %v76_v12 }
  0x99   :  { %142 = vst [vmem:[#allocation2 + $0xc0] sm:$0xff] %v133_v15  ;;  %v1419_v19 = vld [vmem:[#allocation2 + $0xf0] sm:$0xf]  ;;  %v1568_v20 = vld [vmem:[#allocation2 + $0xf4] sm:$0xf] }
  0x9a   :  { %266 = vrot.lane.b32.xlu1 %v1678_v4, %s1610_s13  ;;  %264 = vrot.lane.b32.xlu0 %v1685_v5, %s1610_s13  ;;  %v1420_v21 = vor.u32 %v1571_v16, %v1419_v19  ;;  %v1424_v22 = vor.u32 %v1568_v20, %v1421_v17  ;;  %91 = vst [vmem:[#allocation2 + $0x80] sm:$0xf] %v83_v18 }
  0x9c   :  { %849 = vmatpush.bf16.msra.mxu0 %v1420_v21  ;;  %887 = vmatpush.bf16.msra.mxu2 %v1424_v22  ;;  %v93_v24 = vpop.permute.xlu1 %92  ;;  %v126_v25 = vpop.permute.xlu0 %125 }
  0x9d   :  { %v100_v26 = vrot.slane %v93_v24, 4  ;;  %v130_v28 = vrot.slane %v126_v25, 4  ;;  %268 = vrot.lane.b32.xlu2 %v1703_v7, %s1610_s13  ;;  %v1811_v29 = vpop.permute.xlu2 %41 }
  0x9e   :  { %v47_v19 = vrot.slane %v1811_v29, 4 }
  0x9f   :  { %v104_v30 = vsel %vm49_vm0, %v100_v26, %v101_v39  ;;  %v135_v31 = vsel %vm49_vm0, %v129_v23, %v130_v28  ;;  %v137_v32 = vsel %vm132_vm5, %v126_v25, %v130_v28 }
  0xa0   :  { %v106_v33 = vsel %vm105_vm4, %v93_v24, %v104_v30  ;;  %v136_v34 = vsel %vm132_vm5, %v1749_v27, %v135_v31  ;;  %145 = vst [vmem:[#allocation2 + $0xe0] sm:$0xf] %v137_v32  ;;  %v1562_v42 = vld [vmem:[#allocation2 + $0xc4] sm:$0xf] }
  0xa1   :  { %115 = vst [vmem:[#allocation2 + $0x90] sm:$0xff] %v106_v33 }
  0xa2   :  { %144 = vst [vmem:[#allocation2 + $0xd8] sm:$0xff] %v136_v34  ;;  %446 = vrot.lane.b32.xlu1 %v1685_v5, %s1611_s16  ;;  %444 = vrot.lane.b32.xlu0 %v1694_v6, %s1611_s16  ;;  %v1395_v6 = vld [vmem:[#allocation2 + $0xc0] sm:$0xf] }
  0xa4   :  { %v99_v35 = vpop.permute.xlu1 %98  ;;  %v97_v36 = vpop.permute.xlu0 %96 }
  0xa5   :  { %v103_v37 = vrot.slane %v99_v35, 4  ;;  %v102_v38 = vrot.slane %v97_v36, 4  ;;  %v1825_v39 = vpop.permute.xlu2 %229  ;;  %448 = vrot.lane.b32.xlu2 %v1678_v4, %s1611_s16 }
  0xa6   :  { %v236_v27 = vrot.slane %v1825_v39, 4 }
  0xa7   :  { %v110_v40 = vsel %vm105_vm4, %v99_v35, %v103_v37  ;;  %v108_v41 = vsel %vm49_vm0, %v102_v38, %v103_v37 }
  0xa8   :  { %118 = vst [vmem:[#allocation2 + $0xb0] sm:$0xf] %v110_v40  ;;  %v109_v5 = vsel %vm105_vm4, %v97_v36, %v108_v41  ;;  %v242_v43 = vsel %vm240_vm7, %v1825_v39, %v236_v27  ;;  %v1371_v56 = vld [vmem:[#allocation2 + $0x90] sm:$0xf]  ;;  %v1556_v57 = vld [vmem:[#allocation2 + $0x94] sm:$0xf] }
  0xa9   :  { %117 = vst [vmem:[#allocation2 + $0xa8] sm:$0xff] %v109_v5  ;;  %v1565_v44 = vld [vmem:[#allocation2 + $0xd4] sm:$0xf0]  ;;  %v1397_v45 = vld [vmem:[#allocation2 + $0xd8] sm:$0xf0] }
  0xaa   :  { %450 = vrot.lane.b32.xlu0 %v1703_v7, %s1611_s16  ;;  %v1396_v4 = vor.u32 %v1565_v44, %v1395_v6  ;;  %v1400_v46 = vor.u32 %v1562_v42, %v1397_v45  ;;  %251 = vst [vmem:[#allocation2 + $0x188] sm:$0xf] %v242_v43  ;;  %v1301_v40 = vld [vmem:[#allocation2 + $0x18] sm:$0xf0]  ;;  %v1299_v41 = vld [vmem:[#allocation2] sm:$0xf] }
  0xab   :  { %v1541_v5 = vld [vmem:[#allocation2 + $0x14] sm:$0xf0] }
  0xac   :  { %850 = vmatpush.bf16.msra.mxu0 %v1396_v4  ;;  %888 = vmatpush.bf16.msra.mxu2 %v1400_v46  ;;  %v70_v48 = vpop.permute.xlu1 %69  ;;  %v68_v49 = vpop.permute.xlu0 %67 }
  0xad   :  { %v75_v50 = vrot.slane %v70_v48, 4  ;;  %v74_v51 = vrot.slane %v68_v49, 4  ;;  %v1840_v52 = vpop.permute.xlu2 %418 }
  0xaf   :  { %v81_v53 = vsel %vm49_vm0, %v75_v50, %v76_v12  ;;  %v77_v54 = vsel %vm49_vm0, %v73_v47, %v74_v51  ;;  %v80_v7 = vsel %vm78_vm6, %v68_v49, %v74_v51  ;;  %v426_v47 = vrot.slane %v1840_v52, 4 }
  0xb0   :  { %v82_v58 = vsel %vm78_vm6, %v70_v48, %v81_v53  ;;  %v79_v59 = vsel %vm78_vm6, %v1780_v55, %v77_v54  ;;  %89 = vst [vmem:[#allocation2 + $0x68] sm:$0xf] %v80_v7  ;;  %v1559_v60 = vld [vmem:[#allocation2 + $0xa4] sm:$0xf0]  ;;  %v1373_v61 = vld [vmem:[#allocation2 + $0xa8] sm:$0xf0]  ;;  %v1300_v51 = vor.u32 %v1541_v5, %v1299_v41 }
  0xb1   :  { %90 = vst [vmem:[#allocation2 + $0x78] sm:$0xff] %v82_v58  ;;  %v1372_v62 = vor.u32 %v1559_v60, %v1371_v56  ;;  %v1376_v63 = vor.u32 %v1556_v57, %v1373_v61  ;;  %v1475_v7 = vld [vmem:[#allocation2 + $0x158] sm:$0xf]  ;;  %v1584_v56 = vld [vmem:[#allocation2 + $0x16c] sm:$0xf0] }
  0xb2   :  { %88 = vst [vmem:[#allocation2 + $0x60] sm:$0xff] %v79_v59  ;;  %v1283_v57 = vld [vmem:[%s2114_s1] sm:$0xf]  ;;  %v1535_v59 = vld [vmem:[%s2114_s1 + $0x4] sm:$0xf0]  ;;  %v530_v41 = vld [vmem:[%s2115_s2 + $0x10] sm:$0xff] }
  0xb3   :  { %851 = vmatpush.bf16.msra.mxu0 %v1372_v62  ;;  %889 = vmatpush.bf16.msra.mxu2 %v1376_v63  ;;  %v1534_v60 = vld [vmem:[%s2114_s1 + $0x4] sm:$0xf]  ;;  %v1285_v61 = vld [vmem:[%s2114_s1 + $0x8] sm:$0xf0] }
  0xb4   :  { %v40_v0 = vpop.permute.xlu1 %39  ;;  %v38_v1 = vpop.permute.xlu0 %37 }
  0xb5   :  { %v46_v2 = vrot.slane %v40_v0, 4  ;;  %v45_v3 = vrot.slane %v38_v1, 4  ;;  %v1850_v8 = vpop.permute.xlu2 %424 }
  0xb6   :  { %v429_v9 = vrot.slane %v1850_v8, 4 }
  0xb7   :  { %v53_v55 = vsel %vm51_vm8, %v40_v0, %v46_v2  ;;  %v50_v10 = vsel %vm49_vm0, %v45_v3, %v46_v2 }
  0xb8   :  { %62 = vst [vmem:[#allocation2 + $0x38] sm:$0xf] %v53_v55  ;;  %v52_v11 = vsel %vm51_vm8, %v38_v1, %v50_v10  ;;  %v1553_v12 = vld [vmem:[#allocation2 + $0x74] sm:$0xf0]  ;;  %v1349_v13 = vld [vmem:[#allocation2 + $0x78] sm:$0xf0]  ;;  %v435_v14 = vsel %vm213_vm3, %v1850_v8, %v429_v9 }
  0xb9   :  { %61 = vst [vmem:[#allocation2 + $0x30] sm:$0xff] %v52_v11  ;;  %v1347_v15 = vld [vmem:[#allocation2 + $0x60] sm:$0xf]  ;;  %v1550_v16 = vld [vmem:[#allocation2 + $0x64] sm:$0xf] }
  0xba   :  { %v1348_v17 = vor.u32 %v1553_v12, %v1347_v15  ;;  %v1352_v18 = vor.u32 %v1550_v16, %v1349_v13  ;;  %443 = vst [vmem:[#allocation2 + $0x17c] sm:$0xf] %v435_v14  ;;  %v1499_v13 = vld [vmem:[#allocation2 + $0x188] sm:$0xf]  ;;  %v1904_v14 = vor.u32 %v1535_v59, %v1283_v57  ;;  %v1476_v15 = vor.u32 %v1584_v56, %v1475_v7  ;;  %v1293_v7 = vld [vmem:[%s2114_s1 + $0x18] sm:$0xf0] }
  0xbc   :  { %852 = vmatpush.bf16.msra.mxu0 %v1348_v17  ;;  %890 = vmatpush.bf16.msra.mxu2 %v1352_v18  ;;  %v228_v20 = vpop.permute.xlu1 %227  ;;  %v44_v21 = vpop.permute.xlu0 %43  ;;  %v1906_v17 = vor.u32 %v1534_v60, %v1285_v61  ;;  %v529_v61 = vld [vmem:[%s2115_s2 + $0x8] sm:$0xff] }
  0xbd   :  { %v235_v22 = vrot.slane %v228_v20, 4  ;;  %v48_v23 = vrot.slane %v44_v21, 4  ;;  %v1861_v24 = vpop.permute.xlu2 %396 }
  0xbe   :  { %v402_v5 = vrot.slane %v1861_v24, 4 }
  0xbf   :  { %v239_v25 = vsel %vm49_vm0, %v235_v22, %v236_v27  ;;  %v54_v26 = vsel %vm49_vm0, %v47_v19, %v48_v23  ;;  %v56_v28 = vsel %vm51_vm8, %v44_v21, %v48_v23  ;;  %v1538_v27 = vld [vmem:[#allocation2 + $0x4] sm:$0xf]  ;;  %v1451_v22 = vld [vmem:[#allocation2 + $0x128] sm:$0xf] }
  0xc0   :  { %v241_v30 = vsel %vm240_vm7, %v228_v20, %v239_v25  ;;  %v55_v31 = vsel %vm51_vm8, %v1811_v29, %v54_v26  ;;  %64 = vst [vmem:[#allocation2 + $0x50] sm:$0xf] %v56_v28  ;;  %v1323_v6 = vld [vmem:[#allocation2 + $0x30] sm:$0xf]  ;;  %v1544_v42 = vld [vmem:[#allocation2 + $0x34] sm:$0xf]  ;;  %v1304_v50 = vor.u32 %v1538_v27, %v1301_v40 }
  0xc1   :  { %250 = vst [vmem:[#allocation2 + $0x180] sm:$0xff] %v241_v30  ;;  %v1612_v40 = vmov 0  }
  0xc2   :  { %63 = vst [vmem:[#allocation2 + $0x48] sm:$0xff] %v55_v31  ;;  %v1427_v31 = vld [vmem:[#allocation2 + $0xf8] sm:$0xf]  ;;  %1601 = vset.pattern.permute.xlu1 %v1612_v40  ;;  %1603 = vset.pattern.permute.xlu0 %v1612_v40 }
  0xc3   :  { %544 = vperm.xlu1 %1601, %v530_v41   ;;  %1602 = vset.pattern.permute.xlu2 %v1612_v40 }
  0xc4   :  { %v234_v32 = vpop.permute.xlu1 %233  ;;  %v232_v33 = vpop.permute.xlu0 %231 }
  0xc5   :  { %v238_v34 = vrot.slane %v234_v32, 4  ;;  %v237_v35 = vrot.slane %v232_v33, 4  ;;  %v1871_v36 = vpop.permute.xlu2 %368 }
  0xc6   :  { %v375_v37 = vrot.slane %v1871_v36, 4 }
  0xc7   :  { %v245_v38 = vsel %vm240_vm7, %v234_v32, %v238_v34  ;;  %v243_v39 = vsel %vm49_vm0, %v237_v35, %v238_v34  ;;  %v1572_v32 = vld [vmem:[#allocation2 + $0x10c] sm:$0xf0] }
  0xc8   :  { %253 = vst [vmem:[#allocation2 + $0x1a0] sm:$0xf] %v245_v38  ;;  %v244_v29 = vsel %vm240_vm7, %v232_v33, %v243_v39  ;;  %v380_v43 = vsel %vm159_vm2, %v1871_v36, %v375_v37  ;;  %v1491_v1 = vld [vmem:[#allocation2 + $0x180] sm:$0xf]  ;;  %v1586_v2 = vld [vmem:[#allocation2 + $0x184] sm:$0xf]  ;;  %v1428_v27 = vor.u32 %v1572_v32, %v1427_v31 }
  0xc9   :  { %252 = vst [vmem:[#allocation2 + $0x198] sm:$0xff] %v244_v29  ;;  %v1547_v44 = vld [vmem:[#allocation2 + $0x44] sm:$0xf0]  ;;  %v1325_v45 = vld [vmem:[#allocation2 + $0x48] sm:$0xf0] }
  0xca   :  { %v1324_v4 = vor.u32 %v1547_v44, %v1323_v6  ;;  %v1328_v46 = vor.u32 %v1544_v42, %v1325_v45  ;;  %389 = vst [vmem:[#allocation2 + $0x104] sm:$0xf] %v380_v43  ;;  %v1566_v29 = vld [vmem:[#allocation2 + $0xdc] sm:$0xf0]  ;;  %v1403_v45 = vld [vmem:[#allocation2 + $0xc8] sm:$0xf] }
  0xcb   :  { %539 = vperm.xlu1 %1601, %v529_v61  }
  0xcc   :  { %853 = vmatpush.bf16.msra.mxu0 %v1324_v4  ;;  %891 = vmatpush.bf16.msra.mxu2 %v1328_v46  ;;  %v423_v48 = vpop.permute.xlu1 %422  ;;  %v421_v49 = vpop.permute.xlu0 %420  ;;  %v1404_v46 = vor.u32 %v1566_v29, %v1403_v45 }
  0xcd   :  { %v428_v53 = vrot.slane %v423_v48, 4  ;;  %v427_v54 = vrot.slane %v421_v49, 4  ;;  %v1885_v58 = vpop.permute.xlu2 %340 }
  0xcf   :  { %v433_v62 = vsel %vm49_vm0, %v428_v53, %v429_v9  ;;  %v430_v63 = vsel %vm49_vm0, %v426_v47, %v427_v54  ;;  %v432_v0 = vsel %vm213_vm3, %v421_v49, %v427_v54  ;;  %v1590_v3 = vld [vmem:[#allocation2 + $0x19c] sm:$0xf0]  ;;  %v1291_v47 = vld [vmem:[%s2114_s1 + $0x10] sm:$0xf]  ;;  %v1536_v54 = vld [vmem:[%s2114_s1 + $0x14] sm:$0xf] }
  0xd0   :  { %v434_v55 = vsel %vm213_vm3, %v423_v48, %v433_v62  ;;  %v431_v10 = vsel %vm213_vm3, %v1840_v52, %v430_v63  ;;  %441 = vst [vmem:[#allocation2 + $0x164] sm:$0xf] %v432_v0  ;;  %892 = vmatpush.bf16.msra.mxu2 %v1304_v50  ;;  %v1589_v11 = vld [vmem:[#allocation2 + $0x194] sm:$0xf0]  ;;  %v1493_v12 = vld [vmem:[#allocation2 + $0x198] sm:$0xf0]  ;;  %854 = vmatpush.bf16.msra.mxu0 %v1300_v51 }
  0xd1   :  { %442 = vst [vmem:[#allocation2 + $0x174] sm:$0xff] %v434_v55  ;;  %v1492_v8 = vor.u32 %v1589_v11, %v1491_v1  ;;  %v1496_v9 = vor.u32 %v1586_v2, %v1493_v12  ;;  %v1500_v16 = vor.u32 %v1590_v3, %v1499_v13  ;;  %v1578_v52 = vld [vmem:[#allocation2 + $0x13c] sm:$0xf0]  ;;  %v1537_v48 = vld [vmem:[%s2114_s1 + $0x14] sm:$0xf0]  ;;  %v1952_v60 = vor.u32 %v1536_v54, %v1293_v7 }
  0xd2   :  { %440 = vst [vmem:[#allocation2 + $0x15c] sm:$0xff] %v431_v10  ;;  %v1452_v25 = vor.u32 %v1578_v52, %v1451_v22  ;;  %v1560_v53 = vld [vmem:[#allocation2 + $0xac] sm:$0xf0]  ;;  %v1950_v57 = vor.u32 %v1537_v48, %v1291_v47  ;;  %v528_v62 = vld [vmem:[%s2115_s2] sm:$0xff]  ;;  %v1355_v63 = vld [vmem:[#allocation2 + $0x68] sm:$0xf] }
  0xd3   :  { %873 = vmatpush.bf16.msra.mxu1 %v1492_v8  ;;  %911 = vmatpush.bf16.msra.mxu3 %v1496_v9  ;;  %v1331_v9 = vld [vmem:[#allocation2 + $0x38] sm:$0xf]  ;;  %v1548_v13 = vld [vmem:[#allocation2 + $0x4c] sm:$0xf0]  ;;  %v1542_v52 = vld [vmem:[#allocation2 + $0x1c] sm:$0xf0] }
  0xd4   :  { %v395_v18 = vpop.permute.xlu1 %394  ;;  %v393_v19 = vpop.permute.xlu0 %392  ;;  %893 = vmatmul.bf16.vlgmr.msra.gmra.mxu2 %v1904_v14  ;;  %855 = vmatmul.bf16.vlgmr.msra.gmra.mxu0 %v1904_v14  ;;  %v1332_v22 = vor.u32 %v1548_v13, %v1331_v9  ;;  %v531_v7 = vld [vmem:[%s2115_s2 + $0x18] sm:$0xff] }
  0xd5   :  { %v401_v20 = vrot.slane %v395_v18, 4  ;;  %v400_v21 = vrot.slane %v393_v19, 4  ;;  %v1910_v23 = vpop.permute.xlu2 %346  ;;  %534 = vperm.xlu0 %1603, %v528_v62   ;;  %549 = vperm.xlu2 %1602, %v531_v7  }
  0xd6   :  { %1515 = vmatmul.msk.bf16.vlgmr.msra.gmra.mxu3 %vm840_vm9, %v1906_v17  ;;  %1513 = vmatmul.msk.bf16.vlgmr.msra.gmra.mxu1 %vm840_vm9, %v1906_v17  ;;  %v351_v26 = vrot.slane %v1910_v23, 4 }
  0xd7   :  { %923 = vmatpush.bf16.msrb.mxu1 %v1476_v15  ;;  %949 = vmatpush.bf16.msrb.mxu3 %v1500_v16  ;;  %v406_v28 = vsel %vm186_vm1, %v395_v18, %v401_v20  ;;  %v404_v30 = vsel %vm49_vm0, %v400_v21, %v401_v20  ;;  %v1307_v16 = vld [vmem:[#allocation2 + $0x8] sm:$0xf] }
  0xd8   :  { %415 = vst [vmem:[#allocation2 + $0x134] sm:$0xf] %v406_v28  ;;  %v405_v33 = vsel %vm186_vm1, %v393_v19, %v404_v30  ;;  %v1477_v34 = vld [vmem:[#allocation2 + $0x170] sm:$0xf0]  ;;  %v357_v35 = vsel %vm132_vm5, %v1910_v23, %v351_v26  ;;  %v1308_v31 = vor.u32 %v1542_v52, %v1307_v16 }
  0xd9   :  { %414 = vst [vmem:[#allocation2 + $0x12c] sm:$0xff] %v405_v33  ;;  %v1581_v38 = vld [vmem:[#allocation2 + $0x15c] sm:$0xf]  ;;  %v1483_v32 = vld [vmem:[#allocation2 + $0x160] sm:$0xf] }
  0xda   :  { %v1480_v39 = vor.u32 %v1581_v38, %v1477_v34  ;;  %365 = vst [vmem:[#allocation2 + $0xec] sm:$0xf] %v357_v35  ;;  %v1585_v33 = vld [vmem:[#allocation2 + $0x174] sm:$0xf0] }
  0xdb   :  { %924 = vmatpush.bf16.msrb.mxu1 %v1452_v25  ;;  %v348_v25 = vrot.slane %v1885_v58, 4  ;;  %v1484_v41 = vor.u32 %v1585_v33, %v1483_v32 }
  0xdc   :  { %961 = vmatpush.bf16.msrb.mxu0 %v1480_v39  ;;  %v367_v6 = vpop.permute.xlu1 %366  ;;  %v399_v42 = vpop.permute.xlu0 %398 }
  0xdd   :  { %v374_v43 = vrot.slane %v367_v6, 4  ;;  %v403_v44 = vrot.slane %v399_v42, 4  ;;  %v1928_v4 = vpop.permute.xlu2 %318 }
  0xdf   :  { %925 = vmatpush.bf16.msrb.mxu1 %v1428_v27  ;;  %v378_v49 = vsel %vm49_vm0, %v374_v43, %v375_v37  ;;  %v407_v50 = vsel %vm49_vm0, %v402_v5, %v403_v44  ;;  %v409_v51 = vsel %vm186_vm1, %v399_v42, %v403_v44  ;;  %v1379_v37 = vld [vmem:[#allocation2 + $0x98] sm:$0xf] }
  0xe0   :  { %v379_v56 = vsel %vm159_vm2, %v367_v6, %v378_v49  ;;  %v408_v36 = vsel %vm186_vm1, %v1861_v24, %v407_v50  ;;  %417 = vst [vmem:[#allocation2 + $0x14c] sm:$0xf] %v409_v51  ;;  %v1380_v59 = vor.u32 %v1560_v53, %v1379_v37  ;;  %v1554_v24 = vld [vmem:[#allocation2 + $0x7c] sm:$0xf0]  ;;  %v1575_v19 = vld [vmem:[#allocation2 + $0x12c] sm:$0xf] }
  0xe1   :  { %388 = vst [vmem:[#allocation2 + $0xfc] sm:$0xff] %v379_v56  ;;  %v1356_v10 = vor.u32 %v1554_v24, %v1355_v63  ;;  %v324_v24 = vrot.slane %v1928_v4, 4 }
  0xe2   :  { %416 = vst [vmem:[#allocation2 + $0x144] sm:$0xff] %v408_v36 }
  0xe3   :  { %926 = vmatpush.bf16.msrb.mxu1 %v1404_v46 }
  0xe4   :  { %v373_v0 = vpop.permute.xlu1 %372  ;;  %v371_v1 = vpop.permute.xlu0 %370  ;;  %898 = vmatmul.bf16.gmra.mxu2 %v1950_v57  ;;  %860 = vmatmul.bf16.gmra.mxu0 %v1950_v57 }
  0xe5   :  { %v377_v2 = vrot.slane %v373_v0, 4  ;;  %v376_v3 = vrot.slane %v371_v1, 4  ;;  %v1962_v55 = vpop.permute.xlu2 %290 }
  0xe6   :  { %1516 = vmatmul.msk.bf16.gmra.mxu3 %vm840_vm9, %v1952_v60  ;;  %1514 = vmatmul.msk.bf16.gmra.mxu1 %vm840_vm9, %v1952_v60  ;;  %v297_v11 = vrot.slane %v1962_v55, 4 }
  0xe7   :  { %927 = vmatpush.bf16.msrb.mxu1 %v1380_v59  ;;  %v383_v12 = vsel %vm159_vm2, %v373_v0, %v377_v2  ;;  %v381_v8 = vsel %vm49_vm0, %v376_v3, %v377_v2 }
  0xe8   :  { %391 = vst [vmem:[#allocation2 + $0x11c] sm:$0xf] %v383_v12  ;;  %v382_v15 = vsel %vm159_vm2, %v371_v1, %v381_v8  ;;  %v302_v18 = vsel %vm78_vm6, %v1962_v55, %v297_v11  ;;  %v1569_v5 = vld [vmem:[#allocation2 + $0xfc] sm:$0xf]  ;;  %v1435_v50 = vld [vmem:[#allocation2 + $0x100] sm:$0xf] }
  0xe9   :  { %390 = vst [vmem:[#allocation2 + $0x114] sm:$0xff] %v382_v15  ;;  %v1453_v20 = vld [vmem:[#allocation2 + $0x140] sm:$0xf0]  ;;  %v1579_v43 = vld [vmem:[#allocation2 + $0x144] sm:$0xf0] }
  0xea   :  { %v1456_v21 = vor.u32 %v1575_v19, %v1453_v20  ;;  %311 = vst [vmem:[#allocation2 + $0x74] sm:$0xf] %v302_v18 }
  0xeb   :  { %928 = vmatpush.bf16.msrb.mxu1 %v1356_v10 }
  0xec   :  { %962 = vmatpush.bf16.msrb.mxu0 %v1456_v21  ;;  %v345_v28 = vpop.permute.xlu1 %344  ;;  %v343_v30 = vpop.permute.xlu0 %342 }
  0xed   :  { %v350_v34 = vrot.slane %v345_v28, 4  ;;  %v349_v35 = vrot.slane %v343_v30, 4 }
  0xee   :  { %v1977_v38 = vpop.permute.xlu2 %262 }
  0xef   :  { %929 = vmatpush.bf16.msrb.mxu1 %v1332_v22  ;;  %v355_v39 = vsel %vm49_vm0, %v350_v34, %v351_v26  ;;  %v352_v27 = vsel %vm49_vm0, %v348_v25, %v349_v35  ;;  %v354_v40 = vsel %vm132_vm5, %v343_v30, %v349_v35  ;;  %v1459_v26 = vld [vmem:[#allocation2 + $0x130] sm:$0xf]  ;;  %v270_v32 = vrot.slane %v1977_v38, 4 }
  0xf0   :  { %v356_v29 = vsel %vm132_vm5, %v345_v28, %v355_v39  ;;  %v353_v6 = vsel %vm132_vm5, %v1885_v58, %v352_v27  ;;  %363 = vst [vmem:[#allocation2 + $0xd4] sm:$0xf] %v354_v40  ;;  %v1429_v42 = vld [vmem:[#allocation2 + $0x110] sm:$0xf0]  ;;  %v1460_v44 = vor.u32 %v1579_v43, %v1459_v26  ;;  %v1573_v47 = vld [vmem:[#allocation2 + $0x114] sm:$0xf0] }
  0xf1   :  { %364 = vst [vmem:[#allocation2 + $0xe4] sm:$0xff] %v356_v29  ;;  %v1432_v23 = vor.u32 %v1569_v5, %v1429_v42  ;;  %v1436_v53 = vor.u32 %v1573_v47, %v1435_v50 }
  0xf2   :  { %362 = vst [vmem:[#allocation2 + $0xcc] sm:$0xff] %v353_v6 }
  0xf3   :  { %930 = vmatpush.bf16.msrb.mxu1 %v1308_v31  ;;  %963 = vmatpush.bf16.msrb.mxu0 %v1432_v23 }
  0xf4   :  { %v317_v45 = vpop.permute.xlu1 %316  ;;  %v315_v46 = vpop.permute.xlu0 %314 }
  0xf5   :  { %v323_v48 = vrot.slane %v317_v45, 4  ;;  %v322_v49 = vrot.slane %v315_v46, 4 }
  0xf6   :  { %1517 = vmatmul.msk.bf16.vlgmr.msrb.gmra.mxu3 %vm840_vm9, %v1906_v17  ;;  %931 = vmatmul.bf16.vlgmr.msrb.gmra.mxu1 %v1904_v14 }
  0xf7   :  { %999 = vmatpush.bf16.msra.mxu1 %v1484_v41  ;;  %v328_v58 = vsel %vm105_vm4, %v317_v45, %v323_v48  ;;  %v326_v51 = vsel %vm49_vm0, %v322_v49, %v323_v48  ;;  %v269_v54 = vpop.permute.xlu2 %268 }
  0xf8   :  { %337 = vst [vmem:[#allocation2 + $0xa4] sm:$0xf] %v328_v58  ;;  %v327_v56 = vsel %vm105_vm4, %v315_v46, %v326_v51  ;;  %v1405_v36 = vld [vmem:[#allocation2 + $0xe0] sm:$0xf0]  ;;  %v1567_v37 = vld [vmem:[#allocation2 + $0xe4] sm:$0xf0] }
  0xf9   :  { %336 = vst [vmem:[#allocation2 + $0x9c] sm:$0xff] %v327_v56  ;;  %v1563_v59 = vld [vmem:[#allocation2 + $0xcc] sm:$0xf]  ;;  %v1411_v61 = vld [vmem:[#allocation2 + $0xd0] sm:$0xf]  ;;  %v273_v62 = vrot.slane %v269_v54, 4 }
  0xfa   :  { %v1408_v63 = vor.u32 %v1563_v59, %v1405_v36  ;;  %v1412_v0 = vor.u32 %v1567_v37, %v1411_v61  ;;  %v1539_v58 = vld [vmem:[#allocation2 + $0xc] sm:$0xf]  ;;  %v1309_v51 = vld [vmem:[#allocation2 + $0x20] sm:$0xf0] }
  0xfb   :  { %1000 = vmatpush.bf16.msra.mxu1 %v1460_v44  ;;  %v279_v1 = vsel %vm51_vm8, %v269_v54, %v273_v62 }
  0xfc   :  { %964 = vmatpush.bf16.msrb.mxu0 %v1408_v63  ;;  %v289_v2 = vpop.permute.xlu1 %288  ;;  %v321_v3 = vpop.permute.xlu0 %320  ;;  %287 = vst [vmem:[#allocation2 + $0x5c] sm:$0xf] %v279_v1  ;;  %v1312_v63 = vor.u32 %v1539_v58, %v1309_v51 }
  0xfd   :  { %v296_v10 = vrot.slane %v289_v2, 4  ;;  %v325_v12 = vrot.slane %v321_v3, 4 }
  0xff   :  { %1001 = vmatpush.bf16.msra.mxu1 %v1436_v53  ;;  %v300_v8 = vsel %vm49_vm0, %v296_v10, %v297_v11  ;;  %v329_v9 = vsel %vm49_vm0, %v324_v24, %v325_v12  ;;  %v331_v13 = vsel %vm105_vm4, %v321_v3, %v325_v12  ;;  %v449_v7 = vpop.permute.xlu2 %448  ;;  %v1582_v24 = vld [vmem:[#allocation2 + $0x164] sm:$0xf]  ;;  %v1543_v3 = vld [vmem:[#allocation2 + $0x24] sm:$0xf0] }
 0x100   :  { %v301_v15 = vsel %vm78_vm6, %v289_v2, %v300_v8  ;;  %v330_v16 = vsel %vm105_vm4, %v1928_v4, %v329_v9  ;;  %339 = vst [vmem:[#allocation2 + $0xbc] sm:$0xf] %v331_v13  ;;  %v1557_v4 = vld [vmem:[#allocation2 + $0x9c] sm:$0xf]  ;;  %v1387_v22 = vld [vmem:[#allocation2 + $0xa0] sm:$0xf] }
 0x101   :  { %310 = vst [vmem:[#allocation2 + $0x6c] sm:$0xff] %v301_v15  ;;  %v454_v61 = vrot.slane %v449_v7, 4  ;;  %v1315_v2 = vld [vmem:[#allocation2 + $0x10] sm:$0xf]  ;;  %v1461_v15 = vld [vmem:[#allocation2 + $0x148] sm:$0xf0] }
 0x102   :  { %338 = vst [vmem:[#allocation2 + $0xb4] sm:$0xff] %v330_v16  ;;  %v1316_v9 = vor.u32 %v1543_v3, %v1315_v2  ;;  %v1576_v16 = vld [vmem:[#allocation2 + $0x134] sm:$0xf] }
 0x103   :  { %1002 = vmatpush.bf16.msra.mxu1 %v1412_v0  ;;  %v1485_v0 = vld [vmem:[#allocation2 + $0x178] sm:$0xf0] }
 0x104   :  { %v295_v52 = vpop.permute.xlu1 %294  ;;  %v293_v18 = vpop.permute.xlu0 %292  ;;  %v1488_v8 = vor.u32 %v1582_v24, %v1485_v0 }
 0x105   :  { %v299_v19 = vrot.slane %v295_v52, 4  ;;  %v298_v20 = vrot.slane %v293_v18, 4 }
 0x106   :  { %1518 = vmatmul.msk.bf16.gmra.mxu3 %vm840_vm9, %v1952_v60  ;;  %936 = vmatmul.bf16.gmra.mxu1 %v1950_v57 }
 0x107   :  { %v305_v55 = vsel %vm78_vm6, %v295_v52, %v299_v19  ;;  %v303_v11 = vsel %vm49_vm0, %v298_v20, %v299_v19  ;;  %v1464_v52 = vor.u32 %v1576_v16, %v1461_v15  ;;  %v1570_v19 = vld [vmem:[#allocation2 + $0x104] sm:$0xf]  ;;  %v1413_v20 = vld [vmem:[#allocation2 + $0xe8] sm:$0xf0] }
 0x108   :  { %313 = vst [vmem:[#allocation2 + $0x8c] sm:$0xf] %v305_v55  ;;  %v304_v21 = vsel %vm78_vm6, %v293_v18, %v303_v11  ;;  %v1551_v5 = vld [vmem:[#allocation2 + $0x6c] sm:$0xf]  ;;  %v1363_v29 = vld [vmem:[#allocation2 + $0x70] sm:$0xf] }
 0x109   :  { %312 = vst [vmem:[#allocation2 + $0x84] sm:$0xff] %v304_v21  ;;  %v1381_v25 = vld [vmem:[#allocation2 + $0xb0] sm:$0xf0]  ;;  %v1561_v28 = vld [vmem:[#allocation2 + $0xb4] sm:$0xf0] }
 0x10a   :  { %v1384_v30 = vor.u32 %v1557_v4, %v1381_v25  ;;  %v1388_v31 = vor.u32 %v1561_v28, %v1387_v22  ;;  %v1437_v18 = vld [vmem:[#allocation2 + $0x118] sm:$0xf0]  ;;  %v1564_v21 = vld [vmem:[#allocation2 + $0xd4] sm:$0xf] }
 0x10b   :  { %v1440_v55 = vor.u32 %v1570_v19, %v1437_v18 }
 0x10c   :  { %965 = vmatpush.bf16.msrb.mxu0 %v1384_v30  ;;  %1003 = vmatpush.bf16.msra.mxu1 %v1388_v31  ;;  %v267_v33 = vpop.permute.xlu1 %266  ;;  %v265_v34 = vpop.permute.xlu0 %264 }
 0x10d   :  { %v272_v35 = vrot.slane %v267_v33, 4  ;;  %v271_v39 = vrot.slane %v265_v34, 4 }
 0x10f   :  { %v277_v27 = vsel %vm49_vm0, %v272_v35, %v273_v62  ;;  %v274_v40 = vsel %vm49_vm0, %v270_v32, %v271_v39  ;;  %v276_v41 = vsel %vm51_vm8, %v265_v34, %v271_v39  ;;  %v1416_v34 = vor.u32 %v1564_v21, %v1413_v20  ;;  %v1389_v35 = vld [vmem:[#allocation2 + $0xb8] sm:$0xf0]  ;;  %v1558_v39 = vld [vmem:[#allocation2 + $0xa4] sm:$0xf] }
 0x110   :  { %v278_v6 = vsel %vm51_vm8, %v267_v33, %v277_v27  ;;  %v275_v42 = vsel %vm51_vm8, %v1977_v38, %v274_v40  ;;  %285 = vst [vmem:[#allocation2 + $0x44] sm:$0xf] %v276_v41  ;;  %v1357_v43 = vld [vmem:[#allocation2 + $0x80] sm:$0xf0]  ;;  %v1555_v23 = vld [vmem:[#allocation2 + $0x84] sm:$0xf0]  ;;  %v1392_v27 = vor.u32 %v1558_v39, %v1389_v35 }
 0x111   :  { %286 = vst [vmem:[#allocation2 + $0x54] sm:$0xff] %v278_v6  ;;  %v1360_v26 = vor.u32 %v1551_v5, %v1357_v43  ;;  %v1364_v44 = vor.u32 %v1555_v23, %v1363_v29  ;;  %v1365_v40 = vld [vmem:[#allocation2 + $0x88] sm:$0xf0]  ;;  %v1552_v41 = vld [vmem:[#allocation2 + $0x74] sm:$0xf] }
 0x112   :  { %284 = vst [vmem:[#allocation2 + $0x3c] sm:$0xff] %v275_v42  ;;  %v1368_v5 = vor.u32 %v1552_v41, %v1365_v40  ;;  %v1341_v6 = vld [vmem:[#allocation2 + $0x58] sm:$0xf0]  ;;  %v1540_v42 = vld [vmem:[#allocation2 + $0x14] sm:$0xf] }
 0x113   :  { %966 = vmatpush.bf16.msrb.mxu0 %v1360_v26  ;;  %1004 = vmatpush.bf16.msra.mxu1 %v1364_v44  ;;  %v1317_v43 = vld [vmem:[#allocation2 + $0x28] sm:$0xf0]  ;;  %v1197_v44 = vld [vmem:[%s2116_s4] sm:$0xff] }
 0x114   :  { %v447_v45 = vpop.permute.xlu1 %446  ;;  %v445_v46 = vpop.permute.xlu0 %444  ;;  %v1320_v26 = vor.u32 %v1540_v42, %v1317_v43  ;;  %1200 = vperm.xlu1 %1601, %v1197_v44   ;;  %1115 = vperm.xlu2 %1602, %v1197_v44   ;;  %v2065_v43 = vld [vmem:[%s2117_s3] sm:$0xf] }
 0x115   :  { %v453_v47 = vrot.slane %v447_v45, 4  ;;  %v452_v48 = vrot.slane %v445_v46, 4 }
 0x117   :  { %v458_v49 = vsel %vm240_vm7, %v447_v45, %v453_v47  ;;  %v456_v50 = vsel %vm49_vm0, %v452_v48, %v453_v47  ;;  %v1546_v29 = vld [vmem:[#allocation2 + $0x44] sm:$0xf] }
 0x118   :  { %467 = vst [vmem:[#allocation2 + $0x194] sm:$0xf] %v458_v49  ;;  %v457_v38 = vsel %vm240_vm7, %v445_v46, %v456_v50  ;;  %v1333_v53 = vld [vmem:[#allocation2 + $0x50] sm:$0xf0]  ;;  %v1549_v54 = vld [vmem:[#allocation2 + $0x54] sm:$0xf0]  ;;  %v1344_v23 = vor.u32 %v1546_v29, %v1341_v6 }
 0x119   :  { %466 = vst [vmem:[#allocation2 + $0x18c] sm:$0xff] %v457_v38  ;;  %v1545_v56 = vld [vmem:[#allocation2 + $0x3c] sm:$0xf]  ;;  %v1339_v36 = vld [vmem:[#allocation2 + $0x40] sm:$0xf] }
 0x11a   :  { %v1336_v37 = vor.u32 %v1545_v56, %v1333_v53  ;;  %v1340_v59 = vor.u32 %v1549_v54, %v1339_v36 }
 0x11c   :  { %967 = vmatpush.bf16.msrb.mxu0 %v1336_v37  ;;  %1005 = vmatpush.bf16.msra.mxu1 %v1340_v59  ;;  %v451_v62 = vpop.permute.xlu0 %450 }
 0x11d   :  { %v455_v1 = vrot.slane %v451_v62, 4 }
 0x11f   :  { %v459_v10 = vsel %vm49_vm0, %v454_v61, %v455_v1  ;;  %v461_v12 = vsel %vm240_vm7, %v451_v62, %v455_v1  ;;  %v1588_v32 = vld [vmem:[#allocation2 + $0x194] sm:$0xf] }
 0x120   :  { %v460_v13 = vsel %vm240_vm7, %v449_v7, %v459_v10  ;;  %469 = vst [vmem:[#allocation2 + $0x1ac] sm:$0xf] %v461_v12  ;;  %968 = vmatpush.bf16.msrb.mxu0 %v1312_v63  ;;  %1006 = vmatpush.bf16.msra.mxu1 %v1316_v9  ;;  %v1587_v11 = vld [vmem:[#allocation2 + $0x18c] sm:$0xf]  ;;  %v1507_v25 = vld [vmem:[#allocation2 + $0x190] sm:$0xf] }
 0x121   :  { %468 = vst [vmem:[#allocation2 + $0x1a4] sm:$0xff] %v460_v13 }
 0x123   :  { %969 = vmatmul.bf16.vlgmr.msrb.gmra.mxu0 %v1904_v14  ;;  %1007 = vmatmul.bf16.vlgmr.msra.gmra.mxu1 %v1904_v14 }
 0x124   :  { %1037 = vmatpush.bf16.msra.mxu0 %v1488_v8 }
 0x127   :  { %v1509_v4 = vld [vmem:[#allocation2 + $0x1a8] sm:$0xf0] }
 0x128   :  { %1038 = vmatpush.bf16.msra.mxu0 %v1464_v52  ;;  %v1501_v22 = vld [vmem:[#allocation2 + $0x1a0] sm:$0xf0]  ;;  %v1591_v28 = vld [vmem:[#allocation2 + $0x1a4] sm:$0xf0]  ;;  %v1512_v33 = vor.u32 %v1588_v32, %v1509_v4 }
 0x129   :  { %v1504_v30 = vor.u32 %v1587_v11, %v1501_v22  ;;  %v1508_v31 = vor.u32 %v1591_v28, %v1507_v25 }
 0x12b   :  { %987 = vmatpush.bf16.msrb.mxu2 %v1504_v30  ;;  %1025 = vmatpush.bf16.msra.mxu3 %v1508_v31 }
 0x12c   :  { %1039 = vmatpush.bf16.msra.mxu0 %v1440_v55 }
 0x12e   :  { %1519 = vmatmul.msk.bf16.vlgmr.msrb.gmra.mxu2 %vm840_vm9, %v1906_v17  ;;  %1521 = vmatmul.msk.bf16.vlgmr.msra.gmra.mxu3 %vm840_vm9, %v1906_v17 }
 0x12f   :  { %1063 = vmatpush.bf16.msra.mxu2 %v1512_v33  ;;  %v2053_v56 = vpop.permute.xlu2 %549 }
 0x130   :  { %1040 = vmatpush.bf16.msra.mxu0 %v1416_v34 }
 0x133   :  { %974 = vmatmul.bf16.gmra.mxu0 %v1950_v57  ;;  %1012 = vmatmul.bf16.gmra.mxu1 %v1950_v57 }
 0x134   :  { %1041 = vmatpush.bf16.msra.mxu0 %v1392_v27 }
 0x135   :  { %v2044_v58 = vpop.permute.xlu1 %544 }
 0x138   :  { %1042 = vmatpush.bf16.msra.mxu0 %v1368_v5 }
 0x13c   :  { %1043 = vmatpush.bf16.msra.mxu0 %v1344_v23 }
 0x13e   :  { %1520 = vmatmul.msk.bf16.gmra.mxu2 %vm840_vm9, %v1952_v60  ;;  %1522 = vmatmul.msk.bf16.gmra.mxu3 %vm840_vm9, %v1952_v60 }
 0x140   :  { %1044 = vmatpush.bf16.msra.mxu0 %v1320_v26 }
 0x143   :  { %1045 = vmatmul.bf16.vlgmr.msra.gmra.mxu0 %v1904_v14 }
 0x147   :  { %v2048_v54 = vpop.permute.xlu0 %534 }
 0x14e   :  { %1523 = vmatmul.msk.bf16.vlgmr.msra.gmra.mxu2 %vm840_vm9, %v1906_v17  ;;  %v2050_v17 = vpop.permute.xlu1 %539 }
 0x151   :  { %v856_v45 = vpop.f32.mrf.mxu0 }
 0x152   :  { %v857_v36 = vadd.f32 %v856_v45, %v2048_v54 }
 0x153   :  { %1050 = vmatmul.bf16.gmra.mxu0 %v1950_v57  ;;  %v875_v46 = vpop.f32.mrf.mxu1 }
 0x154   :  { %v876_v3 = vadd.f32 %v875_v46, %v857_v36 }
 0x156   :  { %v1075_v52 = vmax.f32 %v876_v3, 0.0 }
 0x157   :  { %v894_v47 = vpop.f32.mrf.mxu2 }
 0x158   :  { %v895_v37 = vadd.f32 %v894_v47, %v2048_v54 }
 0x159   :  { %v913_v48 = vpop.f32.mrf.mxu3  ;;  %v858_v49 = vpop.f32.mrf.mxu0 }
 0x15a   :  { %v859_v61 = vadd.f32 %v858_v49, %v2050_v17  ;;  %v914_v10 = vadd.f32 %v913_v48, %v895_v37 }
 0x15b   :  { %v877_v50 = vpop.f32.mrf.mxu1 }
 0x15c   :  { %v878_v12 = vadd.f32 %v877_v50, %v859_v61  ;;  %v1076_v18 = vmax.f32 %v914_v10, 0.0 }
 0x15e   :  { %1524 = vmatmul.msk.bf16.gmra.mxu2 %vm840_vm9, %v1952_v60  ;;  %v1081_v55 = vmax.f32 %v878_v12, 0.0  ;;  %v1099_v25 = vpack.c.bf16 %v1076_v18, %v1075_v52 }
 0x15f   :  { %v896_v14 = vpop.f32.mrf.mxu2 }
 0x160   :  { %v897_v62 = vadd.f32 %v896_v14, %v2050_v17  ;;  %v1126_v34 = vunpack.c.l.b16 %v1099_v25  ;;  %v1127_v35 = vunpack.c.h.b16 %v1099_v25 }
 0x161   :  { %v915_v51 = vpop.f32.mrf.mxu3  ;;  %v861_v38 = vpop.f32.mrf.mxu0 }
 0x162   :  { %v862_v57 = vadd.f32 %v861_v38, %v2044_v58  ;;  %v916_v8 = vadd.f32 %v915_v51, %v897_v62 }
 0x163   :  { %v880_v53 = vpop.f32.mrf.mxu1 }
 0x164   :  { %v881_v0 = vadd.f32 %v880_v53, %v862_v57  ;;  %v1082_v11 = vmax.f32 %v916_v8, 0.0 }
 0x166   :  { %v1087_v13 = vmax.f32 %v881_v0, 0.0  ;;  %v1102_v30 = vpack.c.bf16 %v1082_v11, %v1081_v55 }
 0x167   :  { %v899_v7 = vpop.f32.mrf.mxu2 }
 0x168   :  { %v900_v60 = vadd.f32 %v899_v7, %v2044_v58  ;;  %v1129_v40 = vunpack.c.l.b16 %v1102_v30  ;;  %v1130_v41 = vunpack.c.h.b16 %v1102_v30 }
 0x169   :  { %v918_v59 = vpop.f32.mrf.mxu3  ;;  %v863_v63 = vpop.f32.mrf.mxu0 }
 0x16a   :  { %v864_v24 = vadd.f32 %v863_v63, %v2053_v56  ;;  %v919_v1 = vadd.f32 %v918_v59, %v900_v60  ;;  %v1138_v6 = vpack.c.b16 %v1129_v40, %v1126_v34  ;;  %v1139_v42 = vpack.c.b16 %v1130_v41, %v1127_v35 }
 0x16b   :  { %v882_v2 = vpop.f32.mrf.mxu1 }
 0x16c   :  { %v883_v9 = vadd.f32 %v882_v2, %v864_v24  ;;  %v1088_v15 = vmax.f32 %v919_v1, 0.0 }
 0x16e   :  { %v1093_v21 = vmax.f32 %v883_v9, 0.0  ;;  %v1105_v22 = vpack.c.bf16 %v1088_v15, %v1087_v13 }
 0x16f   :  { %v901_v16 = vpop.f32.mrf.mxu2 }
 0x170   :  { %v902_v19 = vadd.f32 %v901_v16, %v2053_v56  ;;  %v1132_v32 = vunpack.c.l.b16 %v1105_v22  ;;  %v1133_v33 = vunpack.c.h.b16 %v1105_v22 }
 0x171   :  { %v920_v20 = vpop.f32.mrf.mxu3 }
 0x172   :  { %v921_v4 = vadd.f32 %v920_v20, %v902_v19 }
 0x173   :  { %v932_v23 = vpop.f32.mrf.mxu1 }
 0x174   :  { %v1094_v28 = vmax.f32 %v921_v4, 0.0  ;;  %v933_v59 = vadd.f32 %v932_v23, %v2048_v54 }
 0x176   :  { %v1108_v31 = vpack.c.bf16 %v1094_v28, %v1093_v21 }
 0x178   :  { %v1135_v39 = vunpack.c.l.b16 %v1108_v31  ;;  %v1136_v27 = vunpack.c.h.b16 %v1108_v31 }
 0x179   :  { %v951_v26 = vpop.f32.mrf.mxu3 }
 0x17a   :  { %v1141_v5 = vpack.c.b16 %v1135_v39, %v1132_v32  ;;  %v1142_v29 = vpack.c.b16 %v1136_v27, %v1133_v33  ;;  %v952_v10 = vadd.f32 %v951_v26, %v933_v59 }
 0x17b   :  { %v934_v45 = vpop.f32.mrf.mxu1 }
 0x17c   :  { %1160 = vmatpush.bf16.msrb.mxu1 %v1141_v5  ;;  %1173 = vmatpush.bf16.msrb.mxu3 %v1142_v29  ;;  %v935_v61 = vadd.f32 %v934_v45, %v2050_v17  ;;  %v1077_v55 = vmax.f32 %v952_v10, 0.0 }
 0x180   :  { %1161 = vmatpush.bf16.msrb.mxu1 %v1138_v6  ;;  %1174 = vmatpush.bf16.msrb.mxu3 %v1139_v42 }
 0x181   :  { %v953_v46 = vpop.f32.mrf.mxu3 }
 0x182   :  { %v954_v12 = vadd.f32 %v953_v46, %v935_v61 }
 0x183   :  { %1525 = vmatmul.msk.bf16.vlgmr.msrb.gmra.mxu1 %vm1150_vm10, %v2065_v43  ;;  %1526 = vmatmul.msk.bf16.vlgmr.msrb.gmra.mxu3 %vm1150_vm10, %v2065_v43  ;;  %v937_v48 = vpop.f32.mrf.mxu1 }
 0x184   :  { %v938_v7 = vadd.f32 %v937_v48, %v2044_v58  ;;  %v1083_v21 = vmax.f32 %v954_v12, 0.0 }
 0x189   :  { %v956_v50 = vpop.f32.mrf.mxu3 }
 0x18a   :  { %v957_v24 = vadd.f32 %v956_v50, %v938_v7 }
 0x18b   :  { %v939_v38 = vpop.f32.mrf.mxu1 }
 0x18c   :  { %v940_v0 = vadd.f32 %v939_v38, %v2053_v56  ;;  %v1089_v13 = vmax.f32 %v957_v24, 0.0 }
 0x191   :  { %v958_v53 = vpop.f32.mrf.mxu3 }
 0x192   :  { %v959_v16 = vadd.f32 %v958_v53, %v940_v0 }
 0x194   :  { %v1095_v4 = vmax.f32 %v959_v16, 0.0 }
 0x1a0   :  { %v970_v44 = vpop.f32.mrf.mxu0  ;;  %v1008_v62 = vpop.f32.mrf.mxu1 }
 0x1a1   :  { %v971_v60 = vadd.f32 %v970_v44, %v2048_v54 }
 0x1a8   :  { %v972_v47 = vpop.f32.mrf.mxu0  ;;  %v1010_v28 = vpop.f32.mrf.mxu1 }
 0x1a9   :  { %v973_v63 = vadd.f32 %v972_v47, %v2050_v17  ;;  %v1196_v47 = vld [vmem:[%s2117_s3] sm:$0xf] }
 0x1b0   :  { %v975_v14 = vpop.f32.mrf.mxu0  ;;  %v1013_v46 = vpop.f32.mrf.mxu1 }
 0x1b1   :  { %v989_v49 = vpop.f32.mrf.mxu2  ;;  %v976_v36 = vadd.f32 %v975_v14, %v2044_v58  ;;  %v1027_v3 = vpop.f32.mrf.mxu3  ;;  %v1014_v38 = vadd.f32 %v1013_v46, %v2044_v58 }
 0x1b2   :  { %v990_v8 = vadd.f32 %v989_v49, %v971_v60 }
 0x1b4   :  { %v1078_v11 = vmax.f32 %v990_v8, 0.0 }
 0x1b6   :  { %v1100_v32 = vpack.c.bf16 %v1078_v11, %v1077_v55 }
 0x1b8   :  { %v977_v57 = vpop.f32.mrf.mxu0  ;;  %v1128_v23 = vunpack.c.l.b16 %v1100_v32  ;;  %v1207_v26 = vunpack.c.h.b16 %v1100_v32  ;;  %v1015_v14 = vpop.f32.mrf.mxu1 }
 0x1b9   :  { %v991_v51 = vpop.f32.mrf.mxu2  ;;  %v978_v15 = vadd.f32 %v977_v57, %v2053_v56  ;;  %v1029_v27 = vpop.f32.mrf.mxu3  ;;  %v1009_v57 = vadd.f32 %v1008_v62, %v2048_v54  ;;  %v1016_v59 = vadd.f32 %v1015_v14, %v2053_v56 }
 0x1ba   :  { %v992_v2 = vadd.f32 %v991_v51, %v973_v63 }
 0x1bb   :  { %v1028_v0 = vadd.f32 %v1027_v3, %v1009_v57 }
 0x1bc   :  { %v1084_v19 = vmax.f32 %v992_v2, 0.0 }
 0x1be   :  { %v1103_v30 = vpack.c.bf16 %v1084_v19, %v1083_v21 }
 0x1c0   :  { %v1046_v9 = vpop.f32.mrf.mxu0  ;;  %v1131_v5 = vunpack.c.l.b16 %v1103_v30  ;;  %v1210_v29 = vunpack.c.h.b16 %v1103_v30 }
 0x1c1   :  { %v994_v37 = vpop.f32.mrf.mxu2  ;;  %v1032_v50 = vpop.f32.mrf.mxu3  ;;  %v1047_v7 = vadd.f32 %v1046_v9, %v2048_v54 }
 0x1c2   :  { %v995_v1 = vadd.f32 %v994_v37, %v976_v36  ;;  %v1140_v44 = vpack.c.b16 %v1131_v5, %v1128_v23  ;;  %v1219_v45 = vpack.c.b16 %v1210_v29, %v1207_v26  ;;  %v1011_v36 = vadd.f32 %v1010_v28, %v2050_v17 }
 0x1c3   :  { %v1033_v63 = vadd.f32 %v1032_v50, %v1014_v38 }
 0x1c4   :  { %v1090_v52 = vmax.f32 %v995_v1, 0.0  ;;  %v1030_v2 = vadd.f32 %v1029_v27, %v1011_v36 }
 0x1c5   :  { %v1091_v54 = vmax.f32 %v1033_v63, 0.0 }
 0x1c6   :  { %v1106_v22 = vpack.c.bf16 %v1090_v52, %v1089_v13  ;;  %v1079_v13 = vmax.f32 %v1028_v0, 0.0 }
 0x1c8   :  { %v1134_v33 = vunpack.c.l.b16 %v1106_v22  ;;  %v1213_v34 = vunpack.c.h.b16 %v1106_v22  ;;  %v1048_v40 = vpop.f32.mrf.mxu0 }
 0x1c9   :  { %v996_v18 = vpop.f32.mrf.mxu2  ;;  %v1049_v37 = vadd.f32 %v1048_v40, %v2050_v17  ;;  %v1034_v61 = vpop.f32.mrf.mxu3 }
 0x1ca   :  { %v997_v20 = vadd.f32 %v996_v18, %v978_v15  ;;  %v1035_v10 = vadd.f32 %v1034_v61, %v1016_v59  ;;  %v1085_v15 = vmax.f32 %v1030_v2, 0.0 }
 0x1cc   :  { %v1096_v25 = vmax.f32 %v997_v20, 0.0  ;;  %v1097_v16 = vmax.f32 %v1035_v10, 0.0 }
 0x1ce   :  { %v1109_v31 = vpack.c.bf16 %v1096_v25, %v1095_v4 }
 0x1d0   :  { %v1137_v35 = vunpack.c.l.b16 %v1109_v31  ;;  %v1216_v39 = vunpack.c.h.b16 %v1109_v31  ;;  %v1051_v49 = vpop.f32.mrf.mxu0 }
 0x1d1   :  { %v1065_v41 = vpop.f32.mrf.mxu2  ;;  %v1052_v53 = vadd.f32 %v1051_v49, %v2044_v58 }
 0x1d2   :  { %v1143_v6 = vpack.c.b16 %v1137_v35, %v1134_v33  ;;  %v1222_v42 = vpack.c.b16 %v1216_v39, %v1213_v34  ;;  %v1066_v1 = vadd.f32 %v1065_v41, %v1047_v7  ;;  %v1116_v34 = vpop.permute.xlu2 %1115 }
 0x1d4   :  { %1186 = vmatpush.bf16.msra.mxu1 %v1143_v6  ;;  %1240 = vmatpush.bf16.msra.mxu3 %v1222_v42  ;;  %v1080_v17 = vmax.f32 %v1066_v1, 0.0  ;;  %v1201_v42 = vpop.permute.xlu1 %1200 }
 0x1d6   :  { %v1101_v55 = vpack.c.bf16 %v1080_v17, %v1079_v13 }
 0x1d8   :  { %1187 = vmatpush.bf16.msra.mxu1 %v1140_v44  ;;  %1241 = vmatpush.bf16.msra.mxu3 %v1219_v45  ;;  %v1208_v30 = vunpack.c.l.b16 %v1101_v55  ;;  %v1209_v31 = vunpack.c.h.b16 %v1101_v55 }
 0x1d9   :  { %v1067_v48 = vpop.f32.mrf.mxu2 }
 0x1da   :  { %v1068_v24 = vadd.f32 %v1067_v48, %v1049_v37 }
 0x1db   :  { %1527 = vmatmul.msk.bf16.vlgmr.msra.gmra.mxu1 %vm1150_vm10, %v2065_v43  ;;  %1528 = vmatmul.msk.bf16.vlgmr.msra.gmra.mxu3 %vm1150_vm10, %v1196_v47  ;;  %v1053_v43 = vpop.f32.mrf.mxu0 }
 0x1dc   :  { %v1054_v58 = vadd.f32 %v1053_v43, %v2053_v56  ;;  %v1086_v8 = vmax.f32 %v1068_v24, 0.0 }
 0x1de   :  { %v1104_v19 = vpack.c.bf16 %v1086_v8, %v1085_v15 }
 0x1e0   :  { %v1211_v56 = vunpack.c.l.b16 %v1104_v19  ;;  %v1212_v22 = vunpack.c.h.b16 %v1104_v19 }
 0x1e1   :  { %v1070_v51 = vpop.f32.mrf.mxu2 }
 0x1e2   :  { %v1071_v60 = vadd.f32 %v1070_v51, %v1052_v53  ;;  %v1220_v32 = vpack.c.b16 %v1211_v56, %v1208_v30  ;;  %v1221_v33 = vpack.c.b16 %v1212_v22, %v1209_v31 }
 0x1e4   :  { %v1092_v62 = vmax.f32 %v1071_v60, 0.0 }
 0x1e6   :  { %v1107_v52 = vpack.c.bf16 %v1092_v62, %v1091_v54 }
 0x1e8   :  { %v1214_v3 = vunpack.c.l.b16 %v1107_v52  ;;  %v1215_v11 = vunpack.c.h.b16 %v1107_v52 }
 0x1e9   :  { %v1072_v12 = vpop.f32.mrf.mxu2 }
 0x1ea   :  { %v1073_v9 = vadd.f32 %v1072_v12, %v1054_v58 }
 0x1ec   :  { %v1098_v18 = vmax.f32 %v1073_v9, 0.0 }
 0x1ee   :  { %v1110_v20 = vpack.c.bf16 %v1098_v18, %v1097_v16 }
 0x1f0   :  { %v1217_v21 = vunpack.c.l.b16 %v1110_v20  ;;  %v1218_v4 = vunpack.c.h.b16 %v1110_v20 }
 0x1f2   :  { %v1223_v25 = vpack.c.b16 %v1217_v21, %v1214_v3  ;;  %v1224_v28 = vpack.c.b16 %v1218_v4, %v1215_v11 }
 0x1f4   :  { %1253 = vmatpush.bf16.msrb.mxu0 %v1223_v25  ;;  %1266 = vmatpush.bf16.msrb.mxu2 %v1224_v28 }
 0x1f8   :  { %1254 = vmatpush.bf16.msrb.mxu0 %v1220_v32  ;;  %1267 = vmatpush.bf16.msrb.mxu2 %v1221_v33 }
 0x1fb   :  { %1529 = vmatmul.msk.bf16.vlgmr.msrb.gmra.mxu0 %vm1150_vm10, %v1196_v47  ;;  %1530 = vmatmul.msk.bf16.vlgmr.msrb.gmra.mxu2 %vm1150_vm10, %v1196_v47 }
 0x200   :  { %v1163_v35 = vpop.f32.mrf.mxu1 }
 0x201   :  { %v1164_v39 = vadd.f32 %v1163_v35, %v1116_v34 }
 0x203   :  { %1193 = vst [vmem:[%s2118_s5] sm:$0xff] %v1164_v39 }
 0x206   :  { %v1176_v27 = vpop.f32.mrf.mxu3 }
 0x207   :  { %v1177_v40 = vadd.f32 %v1176_v27, %v1116_v34 }
 0x208   :  { %v1165_v41 = vpop.f32.mrf.mxu1 }
 0x209   :  { %1194 = vst [vmem:[%s2118_s5 + $0x8] sm:$0xff] %v1177_v40 }
 0x20e   :  { %v1178_v5 = vpop.f32.mrf.mxu3 }
 0x258   :  { %v1189_v29 = vpop.f32.mrf.mxu1 }
 0x259   :  { %v1190_v6 = vadd.f32 %v1189_v29, %v1116_v34 }
 0x25b   :  { %1195 = vst [vmem:[%s2118_s5 + $0x10] sm:$0xff] %v1190_v6 }
 0x25e   :  { %v1243_v23 = vpop.f32.mrf.mxu3 }
 0x25f   :  { %v1244_v26 = vadd.f32 %v1243_v23, %v1201_v42 }
 0x260   :  { %v1191_v44 = vpop.f32.mrf.mxu1 }
 0x261   :  { %1531 = vst [vmem:[%s2118_s5 + $0x18] sm:$0xff] %v1244_v26 }
 0x266   :  { %v1245_v45 = vpop.f32.mrf.mxu3 }
 0x278   :  { %v1256_v46 = vpop.f32.mrf.mxu0 }
 0x279   :  { %v1257_v47 = vadd.f32 %v1256_v46, %v1201_v42 }
 0x27b   :  { %1532 = vst [vmem:[%s2118_s5 + $0x20] sm:$0xff] %v1257_v47 }
 0x27e   :  { %v1269_v48 = vpop.f32.mrf.mxu2 }
 0x27f   :  { %v1270_v49 = vadd.f32 %v1269_v48, %v1201_v42 }
 0x280   :  { %v1258_v50 = vpop.f32.mrf.mxu0 }
 0x281   :  { %1533 = vst [vmem:[%s2118_s5 + $0x28] sm:$0xff] %v1270_v49 }
 0x286   :  { %v1271_v14 = vpop.f32.mrf.mxu2 }

</bundles_post_ra>
